<compile_context>
chip_gen: v6e
topology: v6e:2x2x1
jax: 0.10.0
libtpu: 0.0.40
codegen_flags: <defaults>
</compile_context>

<pallas_src>
import jax
import jax.numpy as jnp
import numpy as np
from jax.experimental import pallas as pl
from jax.experimental.pallas import tpu as pltpu


HP = 128   # padded hidden size (one full vreg lane width); real H = 64


# ----------------------------------------------------------------------------
# Pallas kernel: LSTM recurrence (PyTorch gate order i, f, g, o) + MLP head.
# ----------------------------------------------------------------------------
def _critic_kernel(xg_ref,    # (T, B, 4*Hp)  precomputed x_t @ W_ih + b, gate blocks 128-aligned
                   whh_ref,   # (Hp, 4*Hp)    hidden->gates (transposed, zero-padded)
                   w1_ref,    # (Hp, 2L)
                   w2_ref,    # (2L, Lp)
                   w3_ref,    # (1, Lp)       final projection as a row vector
                   out_ref):  # (B, 128)      lane-dense output slab (col 0 is the result)
    T, B, _ = xg_ref.shape
    Hp = whh_ref.shape[0]

    h = jnp.zeros((B, Hp), jnp.float32)
    c = jnp.zeros((B, Hp), jnp.float32)

    # Fully unrolled recurrence: T is a small static trip count.  The only work
    # on the serial path is one (B,Hp)x(Hp,4Hp) matmul plus VPU/EUP gate math;
    # the input projection + bias were hoisted into xg.  W_hh is read from VMEM
    # per step (padded it is 256 KB — too big to pin in the 64-vreg file).
    for t in range(T):
        gates = xg_ref[t] + jnp.dot(h, whh_ref[...],
                                    preferred_element_type=jnp.float32)  # (B, 4Hp)
        # Each gate slice starts on a 128-lane boundary -> whole-vreg views.
        i_g = jax.nn.sigmoid(gates[:, 0 * Hp:1 * Hp])
        f_g = jax.nn.sigmoid(gates[:, 1 * Hp:2 * Hp])
        g_g = jnp.tanh(gates[:, 2 * Hp:3 * Hp])
        o_g = jax.nn.sigmoid(gates[:, 3 * Hp:4 * Hp])
        c = f_g * c + i_g * g_g
        h = o_g * jnp.tanh(c)

    # MLP head (runs once).
    z1 = jnp.maximum(
        jnp.dot(h, w1_ref[...], preferred_element_type=jnp.float32), 0.0)   # (B, 2L)
    z2 = jnp.maximum(
        jnp.dot(z1, w2_ref[...], preferred_element_type=jnp.float32), 0.0)  # (B, Lp)
    # Final (Lp -> 1) projection: VPU mul + XLU reduce instead of an N=1 MXU op.
    z3 = jnp.sum(z2 * w3_ref[...], axis=-1, keepdims=True)                  # (B, 1)
    # Lane-dense unmasked store; wrapper slices column 0.
    out_ref[...] = jnp.broadcast_to(jax.nn.sigmoid(z3), out_ref.shape)


def critic_pallas(xg, whh_p, w1_p, w2_p, w3_row):
    """xg: (T, B, 4*Hp) f32 precomputed input gates. Returns (B,) f32 post-sigmoid."""
    T, B, G = xg.shape
    vmem = pl.BlockSpec(memory_space=pltpu.MemorySpace.VMEM)
    out = pl.pallas_call(
        _critic_kernel,
        out_shape=jax.ShapeDtypeStruct((B, 128), jnp.float32),
        in_specs=[vmem] * 5,
        out_specs=vmem,
        # Total VMEM footprint < 1 MiB on all of v5e/v6e/v7x -> no tiling/grid.
    )(xg, whh_p, w1_p, w2_p, w3_row)
    return out[:, 0]


# ----------------------------------------------------------------------------
# Weight padding / layout prep (done once, outside the kernel).
# ----------------------------------------------------------------------------
def _pad_gate_cols(w, H, Hp):
    """(R, 4H) i,f,g,o gate matrix -> (R, 4Hp) with each gate at a 128-lane offset."""
    R = w.shape[0]
    out = jnp.zeros((R, 4 * Hp), w.dtype)
    for k in range(4):
        out = out.at[:, k * Hp:k * Hp + H].set(w[:, k * H:(k + 1) * H])
    return out


def pad_params(params):
    H = params["whh_t"].shape[0]
    L = params["w3t"].shape[0]
    Hp = HP
    Lp = HP
    wih_p = _pad_gate_cols(params["wih_t"], H, Hp)                              # (D, 4Hp)
    b_p = _pad_gate_cols(params["b2d"], H, Hp)                                  # (1, 4Hp)
    whh_p = jnp.pad(_pad_gate_cols(params["whh_t"], H, Hp), ((0, Hp - H), (0, 0)))
    w1_p = jnp.pad(params["w1t"], ((0, Hp - H), (0, 0)))                        # (Hp, 2L)
    w2_p = jnp.pad(params["w2t"], ((0, 0), (0, Lp - L)))                        # (2L, Lp)
    w3_row = jnp.pad(params["w3t"].T, ((0, 0), (0, Lp - L)))                    # (1, Lp)
    return dict(wih_p=wih_p, b_p=b_p, whh_p=whh_p, w1_p=w1_p, w2_p=w2_p, w3_row=w3_row)


# ----------------------------------------------------------------------------
# Glue: embedding lookup + concat + hoisted input projection (plain JAX).
# ----------------------------------------------------------------------------
@jax.jit
def critic_forward(prev, label, params):
    """prev: (B, S, 4) f32, label: (B, 4) f32; column 3 holds action indices."""
    temporal = jnp.concatenate([prev, label[:, None, :]], axis=1)   # (B, T, 4)
    actions = temporal[:, :, 3].astype(jnp.int32)                   # (B, T)
    embeds = params["embedding"][actions]                           # (B, T, E)
    x = jnp.concatenate([temporal[:, :, :3], embeds], axis=2)       # (B, T, 3+E)
    x_tbd = jnp.transpose(x, (1, 0, 2)).astype(jnp.float32)         # (T, B, D)

    pp = pad_params(params)
    # Hoisted input projection for all T timesteps at once (M = T*B), off the
    # serial recurrence path.  Bias folded in here as well.
    xg = jnp.einsum("tbd,dg->tbg", x_tbd, pp["wih_p"]) + pp["b_p"][None]  # (T, B, 4Hp)
    return critic_pallas(xg, pp["whh_p"], pp["w1_p"], pp["w2_p"], pp["w3_row"])


# ----------------------------------------------------------------------------
# Pure-JAX reference (unpadded weights) for correctness checking.
# ----------------------------------------------------------------------------
def critic_reference(prev, label, params):
    temporal = jnp.concatenate([prev, label[:, None, :]], axis=1)
    actions = temporal[:, :, 3].astype(jnp.int32)
    embeds = params["embedding"][actions]
    x = jnp.concatenate([temporal[:, :, :3], embeds], axis=2)
    x_tbd = jnp.transpose(x, (1, 0, 2)).astype(jnp.float32)
    T, B, D = x_tbd.shape
    H = params["whh_t"].shape[0]
    h = jnp.zeros((B, H), jnp.float32)
    c = jnp.zeros((B, H), jnp.float32)
    for t in range(T):
        gates = x_tbd[t] @ params["wih_t"] + h @ params["whh_t"] + params["b2d"]
        i_g = jax.nn.sigmoid(gates[:, 0 * H:1 * H])
        f_g = jax.nn.sigmoid(gates[:, 1 * H:2 * H])
        g_g = jnp.tanh(gates[:, 2 * H:3 * H])
        o_g = jax.nn.sigmoid(gates[:, 3 * H:4 * H])
        c = f_g * c + i_g * g_g
        h = o_g * jnp.tanh(c)
    z = jnp.maximum(h @ params["w1t"], 0.0)
    z = jnp.maximum(z @ params["w2t"], 0.0)
    return jax.nn.sigmoid(z @ params["w3t"])[:, 0]


# ----------------------------------------------------------------------------
# Deterministic parameter init (shapes from the module __init__).
# ----------------------------------------------------------------------------
def init_params(key, action_size, embed_dim, hidden_size, l1_size):
    d_in = 3 + embed_dim
    ks = jax.random.split(key, 8)
    s = 0.1
    return {
        "embedding": s * jax.random.normal(ks[0], (action_size, embed_dim), jnp.float32),
        # LSTM weights stored transposed: (in, 4H) / (H, 4H); gate order i,f,g,o.
        "wih_t": s * jax.random.normal(ks[1], (d_in, 4 * hidden_size), jnp.float32),
        "whh_t": s * jax.random.normal(ks[2], (hidden_size, 4 * hidden_size), jnp.float32),
        "b2d": (s * jax.random.normal(ks[3], (1, 4 * hidden_size), jnp.float32)
                + s * jax.random.normal(ks[4], (1, 4 * hidden_size), jnp.float32)),
        # Linear layers (bias=False), stored transposed to (in, out).
        "w1t": s * jax.random.normal(ks[5], (hidden_size, 2 * l1_size), jnp.float32),
        "w2t": s * jax.random.normal(ks[6], (2 * l1_size, l1_size), jnp.float32),
        "w3t": s * jax.random.normal(ks[7], (l1_size, 1), jnp.float32),
    }


if __name__ == "__main__":
    # Small shapes consistent with the module defaults.
    B = 8                 # batch
    S = 8                 # sequence_length (prev); kernel sees T = S + 1
    ACTION_SIZE = 31
    EMBED_DIM = 16
    HIDDEN = 64
    L1 = 64

    key = jax.random.PRNGKey(0)
    kp, kl, kap, kal, kw = jax.random.split(key, 5)

    prev_cont = jax.random.normal(kp, (B, S, 3), jnp.float32)
    prev_act = jax.random.randint(kap, (B, S, 1), 0, ACTION_SIZE).astype(jnp.float32)
    prev = jnp.concatenate([prev_cont, prev_act], axis=2)          # (B, S, 4)

    label_cont = jax.random.normal(kl, (B, 3), jnp.float32)
    label_act = jax.random.randint(kal, (B, 1), 0, ACTION_SIZE).astype(jnp.float32)
    label = jnp.concatenate([label_cont, label_act], axis=1)       # (B, 4)

    params = init_params(kw, ACTION_SIZE, EMBED_DIM, HIDDEN, L1)

    out = jax.block_until_ready(critic_forward(prev, label, params))
    ref = jax.block_until_ready(critic_reference(prev, label, params))

    np.testing.assert_allclose(np.asarray(out), np.asarray(ref), rtol=1e-5, atol=1e-5)
    assert out.shape == (B,)
    print("KERNEL_OK")
</pallas_src>

<mosaic_0001>
module attributes {stable_mosaic.version = 11 : i64} {
  func.func @_critic_kernel(%arg0: memref<9x8x512xf32, #tpu.memory_space<vmem>>, %arg1: memref<128x512xf32, #tpu.memory_space<vmem>>, %arg2: memref<128x128xf32, #tpu.memory_space<vmem>>, %arg3: memref<128x128xf32, #tpu.memory_space<vmem>>, %arg4: memref<1x128xf32, #tpu.memory_space<vmem>>, %arg5: memref<8x128xf32, #tpu.memory_space<vmem>>) attributes {dimension_semantics = [], scalar_prefetch = 0 : i64, scratch_operands = 0 : i64, tpu.core_type = #tpu.core_type<tc>} {
    %cst = arith.constant 0.000000e+00 : f32
    %0 = vector.broadcast %cst : f32 to vector<8x128xf32>
    %cst_0 = arith.constant 0.000000e+00 : f32
    %1 = vector.broadcast %cst_0 : f32 to vector<8x128xf32>
    %c0 = arith.constant 0 : index
    %c0_1 = arith.constant 0 : index
    %c0_2 = arith.constant 0 : index
    %2 = vector.load %arg0[%c0, %c0_1, %c0_2] : memref<9x8x512xf32, #tpu.memory_space<vmem>>, vector<1x8x512xf32>
    %3 = vector.shape_cast %2 : vector<1x8x512xf32> to vector<8x512xf32>
    %c0_3 = arith.constant 0 : index
    %c0_4 = arith.constant 0 : index
    %4 = vector.load %arg1[%c0_3, %c0_4] : memref<128x512xf32, #tpu.memory_space<vmem>>, vector<128x512xf32>
    %cst_5 = arith.constant dense<0.000000e+00> : vector<8x512xf32>
    %5 = tpu.matmul %0, %4, %cst_5 {dimension_numbers = #tpu.dot_dimension_numbers<[1], [0], [0], [1], [0, 0, 1, 1], [], []>} : vector<8x128xf32>, vector<128x512xf32>, vector<8x512xf32> -> vector<8x512xf32>
    %6 = arith.addf %3, %5 : vector<8x512xf32>
    %7 = vector.extract_strided_slice %6 {offsets = [0, 0], sizes = [8, 128], strides = [1, 1]} : vector<8x512xf32> to vector<8x128xf32>
    %8 = arith.negf %7 : vector<8x128xf32>
    %9 = math.exp %8 : vector<8x128xf32>
    %cst_6 = arith.constant 1.000000e+00 : f32
    %10 = vector.broadcast %cst_6 : f32 to vector<8x128xf32>
    %11 = arith.addf %10, %9 : vector<8x128xf32>
    %12 = arith.divf %10, %11 : vector<8x128xf32>
    %13 = vector.extract_strided_slice %6 {offsets = [0, 128], sizes = [8, 128], strides = [1, 1]} : vector<8x512xf32> to vector<8x128xf32>
    %14 = arith.negf %13 : vector<8x128xf32>
    %15 = math.exp %14 : vector<8x128xf32>
    %cst_7 = arith.constant 1.000000e+00 : f32
    %16 = vector.broadcast %cst_7 : f32 to vector<8x128xf32>
    %17 = arith.addf %16, %15 : vector<8x128xf32>
    %18 = arith.divf %16, %17 : vector<8x128xf32>
    %19 = vector.extract_strided_slice %6 {offsets = [0, 256], sizes = [8, 128], strides = [1, 1]} : vector<8x512xf32> to vector<8x128xf32>
    %20 = math.tanh %19 : vector<8x128xf32>
    %21 = vector.extract_strided_slice %6 {offsets = [0, 384], sizes = [8, 128], strides = [1, 1]} : vector<8x512xf32> to vector<8x128xf32>
    %22 = arith.negf %21 : vector<8x128xf32>
    %23 = math.exp %22 : vector<8x128xf32>
    %cst_8 = arith.constant 1.000000e+00 : f32
    %24 = vector.broadcast %cst_8 : f32 to vector<8x128xf32>
    %25 = arith.addf %24, %23 : vector<8x128xf32>
    %26 = arith.divf %24, %25 : vector<8x128xf32>
    %27 = arith.mulf %18, %1 : vector<8x128xf32>
    %28 = arith.mulf %12, %20 : vector<8x128xf32>
    %29 = arith.addf %27, %28 : vector<8x128xf32>
    %30 = math.tanh %29 : vector<8x128xf32>
    %31 = arith.mulf %26, %30 : vector<8x128xf32>
    %c1 = arith.constant 1 : index
    %c0_9 = arith.constant 0 : index
    %c0_10 = arith.constant 0 : index
    %32 = vector.load %arg0[%c1, %c0_9, %c0_10] : memref<9x8x512xf32, #tpu.memory_space<vmem>>, vector<1x8x512xf32>
    %33 = vector.shape_cast %32 : vector<1x8x512xf32> to vector<8x512xf32>
    %c0_11 = arith.constant 0 : index
    %c0_12 = arith.constant 0 : index
    %34 = vector.load %arg1[%c0_11, %c0_12] : memref<128x512xf32, #tpu.memory_space<vmem>>, vector<128x512xf32>
    %cst_13 = arith.constant dense<0.000000e+00> : vector<8x512xf32>
    %35 = tpu.matmul %31, %34, %cst_13 {dimension_numbers = #tpu.dot_dimension_numbers<[1], [0], [0], [1], [0, 0, 1, 1], [], []>} : vector<8x128xf32>, vector<128x512xf32>, vector<8x512xf32> -> vector<8x512xf32>
    %36 = arith.addf %33, %35 : vector<8x512xf32>
    %37 = vector.extract_strided_slice %36 {offsets = [0, 0], sizes = [8, 128], strides = [1, 1]} : vector<8x512xf32> to vector<8x128xf32>
    %38 = arith.negf %37 : vector<8x128xf32>
    %39 = math.exp %38 : vector<8x128xf32>
    %cst_14 = arith.constant 1.000000e+00 : f32
    %40 = vector.broadcast %cst_14 : f32 to vector<8x128xf32>
    %41 = arith.addf %40, %39 : vector<8x128xf32>
    %42 = arith.divf %40, %41 : vector<8x128xf32>
    %43 = vector.extract_strided_slice %36 {offsets = [0, 128], sizes = [8, 128], strides = [1, 1]} : vector<8x512xf32> to vector<8x128xf32>
    %44 = arith.negf %43 : vector<8x128xf32>
    %45 = math.exp %44 : vector<8x128xf32>
    %cst_15 = arith.constant 1.000000e+00 : f32
    %46 = vector.broadcast %cst_15 : f32 to vector<8x128xf32>
    %47 = arith.addf %46, %45 : vector<8x128xf32>
    %48 = arith.divf %46, %47 : vector<8x128xf32>
    %49 = vector.extract_strided_slice %36 {offsets = [0, 256], sizes = [8, 128], strides = [1, 1]} : vector<8x512xf32> to vector<8x128xf32>
    %50 = math.tanh %49 : vector<8x128xf32>
    %51 = vector.extract_strided_slice %36 {offsets = [0, 384], sizes = [8, 128], strides = [1, 1]} : vector<8x512xf32> to vector<8x128xf32>
    %52 = arith.negf %51 : vector<8x128xf32>
    %53 = math.exp %52 : vector<8x128xf32>
    %cst_16 = arith.constant 1.000000e+00 : f32
    %54 = vector.broadcast %cst_16 : f32 to vector<8x128xf32>
    %55 = arith.addf %54, %53 : vector<8x128xf32>
    %56 = arith.divf %54, %55 : vector<8x128xf32>
    %57 = arith.mulf %48, %29 : vector<8x128xf32>
    %58 = arith.mulf %42, %50 : vector<8x128xf32>
    %59 = arith.addf %57, %58 : vector<8x128xf32>
    %60 = math.tanh %59 : vector<8x128xf32>
    %61 = arith.mulf %56, %60 : vector<8x128xf32>
    %c2 = arith.constant 2 : index
    %c0_17 = arith.constant 0 : index
    %c0_18 = arith.constant 0 : index
    %62 = vector.load %arg0[%c2, %c0_17, %c0_18] : memref<9x8x512xf32, #tpu.memory_space<vmem>>, vector<1x8x512xf32>
    %63 = vector.shape_cast %62 : vector<1x8x512xf32> to vector<8x512xf32>
    %c0_19 = arith.constant 0 : index
    %c0_20 = arith.constant 0 : index
    %64 = vector.load %arg1[%c0_19, %c0_20] : memref<128x512xf32, #tpu.memory_space<vmem>>, vector<128x512xf32>
    %cst_21 = arith.constant dense<0.000000e+00> : vector<8x512xf32>
    %65 = tpu.matmul %61, %64, %cst_21 {dimension_numbers = #tpu.dot_dimension_numbers<[1], [0], [0], [1], [0, 0, 1, 1], [], []>} : vector<8x128xf32>, vector<128x512xf32>, vector<8x512xf32> -> vector<8x512xf32>
    %66 = arith.addf %63, %65 : vector<8x512xf32>
    %67 = vector.extract_strided_slice %66 {offsets = [0, 0], sizes = [8, 128], strides = [1, 1]} : vector<8x512xf32> to vector<8x128xf32>
    %68 = arith.negf %67 : vector<8x128xf32>
    %69 = math.exp %68 : vector<8x128xf32>
    %cst_22 = arith.constant 1.000000e+00 : f32
    %70 = vector.broadcast %cst_22 : f32 to vector<8x128xf32>
    %71 = arith.addf %70, %69 : vector<8x128xf32>
    %72 = arith.divf %70, %71 : vector<8x128xf32>
    %73 = vector.extract_strided_slice %66 {offsets = [0, 128], sizes = [8, 128], strides = [1, 1]} : vector<8x512xf32> to vector<8x128xf32>
    %74 = arith.negf %73 : vector<8x128xf32>
    %75 = math.exp %74 : vector<8x128xf32>
    %cst_23 = arith.constant 1.000000e+00 : f32
    %76 = vector.broadcast %cst_23 : f32 to vector<8x128xf32>
    %77 = arith.addf %76, %75 : vector<8x128xf32>
    %78 = arith.divf %76, %77 : vector<8x128xf32>
    %79 = vector.extract_strided_slice %66 {offsets = [0, 256], sizes = [8, 128], strides = [1, 1]} : vector<8x512xf32> to vector<8x128xf32>
    %80 = math.tanh %79 : vector<8x128xf32>
    %81 = vector.extract_strided_slice %66 {offsets = [0, 384], sizes = [8, 128], strides = [1, 1]} : vector<8x512xf32> to vector<8x128xf32>
    %82 = arith.negf %81 : vector<8x128xf32>
    %83 = math.exp %82 : vector<8x128xf32>
    %cst_24 = arith.constant 1.000000e+00 : f32
    %84 = vector.broadcast %cst_24 : f32 to vector<8x128xf32>
    %85 = arith.addf %84, %83 : vector<8x128xf32>
    %86 = arith.divf %84, %85 : vector<8x128xf32>
    %87 = arith.mulf %78, %59 : vector<8x128xf32>
    %88 = arith.mulf %72, %80 : vector<8x128xf32>
    %89 = arith.addf %87, %88 : vector<8x128xf32>
    %90 = math.tanh %89 : vector<8x128xf32>
    %91 = arith.mulf %86, %90 : vector<8x128xf32>
    %c3 = arith.constant 3 : index
    %c0_25 = arith.constant 0 : index
    %c0_26 = arith.constant 0 : index
    %92 = vector.load %arg0[%c3, %c0_25, %c0_26] : memref<9x8x512xf32, #tpu.memory_space<vmem>>, vector<1x8x512xf32>
    %93 = vector.shape_cast %92 : vector<1x8x512xf32> to vector<8x512xf32>
    %c0_27 = arith.constant 0 : index
    %c0_28 = arith.constant 0 : index
    %94 = vector.load %arg1[%c0_27, %c0_28] : memref<128x512xf32, #tpu.memory_space<vmem>>, vector<128x512xf32>
    %cst_29 = arith.constant dense<0.000000e+00> : vector<8x512xf32>
    %95 = tpu.matmul %91, %94, %cst_29 {dimension_numbers = #tpu.dot_dimension_numbers<[1], [0], [0], [1], [0, 0, 1, 1], [], []>} : vector<8x128xf32>, vector<128x512xf32>, vector<8x512xf32> -> vector<8x512xf32>
    %96 = arith.addf %93, %95 : vector<8x512xf32>
    %97 = vector.extract_strided_slice %96 {offsets = [0, 0], sizes = [8, 128], strides = [1, 1]} : vector<8x512xf32> to vector<8x128xf32>
    %98 = arith.negf %97 : vector<8x128xf32>
    %99 = math.exp %98 : vector<8x128xf32>
    %cst_30 = arith.constant 1.000000e+00 : f32
    %100 = vector.broadcast %cst_30 : f32 to vector<8x128xf32>
    %101 = arith.addf %100, %99 : vector<8x128xf32>
    %102 = arith.divf %100, %101 : vector<8x128xf32>
    %103 = vector.extract_strided_slice %96 {offsets = [0, 128], sizes = [8, 128], strides = [1, 1]} : vector<8x512xf32> to vector<8x128xf32>
    %104 = arith.negf %103 : vector<8x128xf32>
    %105 = math.exp %104 : vector<8x128xf32>
    %cst_31 = arith.constant 1.000000e+00 : f32
    %106 = vector.broadcast %cst_31 : f32 to vector<8x128xf32>
    %107 = arith.addf %106, %105 : vector<8x128xf32>
    %108 = arith.divf %106, %107 : vector<8x128xf32>
    %109 = vector.extract_strided_slice %96 {offsets = [0, 256], sizes = [8, 128], strides = [1, 1]} : vector<8x512xf32> to vector<8x128xf32>
    %110 = math.tanh %109 : vector<8x128xf32>
    %111 = vector.extract_strided_slice %96 {offsets = [0, 384], sizes = [8, 128], strides = [1, 1]} : vector<8x512xf32> to vector<8x128xf32>
    %112 = arith.negf %111 : vector<8x128xf32>
    %113 = math.exp %112 : vector<8x128xf32>
    %cst_32 = arith.constant 1.000000e+00 : f32
    %114 = vector.broadcast %cst_32 : f32 to vector<8x128xf32>
    %115 = arith.addf %114, %113 : vector<8x128xf32>
    %116 = arith.divf %114, %115 : vector<8x128xf32>
    %117 = arith.mulf %108, %89 : vector<8x128xf32>
    %118 = arith.mulf %102, %110 : vector<8x128xf32>
    %119 = arith.addf %117, %118 : vector<8x128xf32>
    %120 = math.tanh %119 : vector<8x128xf32>
    %121 = arith.mulf %116, %120 : vector<8x128xf32>
    %c4 = arith.constant 4 : index
    %c0_33 = arith.constant 0 : index
    %c0_34 = arith.constant 0 : index
    %122 = vector.load %arg0[%c4, %c0_33, %c0_34] : memref<9x8x512xf32, #tpu.memory_space<vmem>>, vector<1x8x512xf32>
    %123 = vector.shape_cast %122 : vector<1x8x512xf32> to vector<8x512xf32>
    %c0_35 = arith.constant 0 : index
    %c0_36 = arith.constant 0 : index
    %124 = vector.load %arg1[%c0_35, %c0_36] : memref<128x512xf32, #tpu.memory_space<vmem>>, vector<128x512xf32>
    %cst_37 = arith.constant dense<0.000000e+00> : vector<8x512xf32>
    %125 = tpu.matmul %121, %124, %cst_37 {dimension_numbers = #tpu.dot_dimension_numbers<[1], [0], [0], [1], [0, 0, 1, 1], [], []>} : vector<8x128xf32>, vector<128x512xf32>, vector<8x512xf32> -> vector<8x512xf32>
    %126 = arith.addf %123, %125 : vector<8x512xf32>
    %127 = vector.extract_strided_slice %126 {offsets = [0, 0], sizes = [8, 128], strides = [1, 1]} : vector<8x512xf32> to vector<8x128xf32>
    %128 = arith.negf %127 : vector<8x128xf32>
    %129 = math.exp %128 : vector<8x128xf32>
    %cst_38 = arith.constant 1.000000e+00 : f32
    %130 = vector.broadcast %cst_38 : f32 to vector<8x128xf32>
    %131 = arith.addf %130, %129 : vector<8x128xf32>
    %132 = arith.divf %130, %131 : vector<8x128xf32>
    %133 = vector.extract_strided_slice %126 {offsets = [0, 128], sizes = [8, 128], strides = [1, 1]} : vector<8x512xf32> to vector<8x128xf32>
    %134 = arith.negf %133 : vector<8x128xf32>
    %135 = math.exp %134 : vector<8x128xf32>
    %cst_39 = arith.constant 1.000000e+00 : f32
    %136 = vector.broadcast %cst_39 : f32 to vector<8x128xf32>
    %137 = arith.addf %136, %135 : vector<8x128xf32>
    %138 = arith.divf %136, %137 : vector<8x128xf32>
    %139 = vector.extract_strided_slice %126 {offsets = [0, 256], sizes = [8, 128], strides = [1, 1]} : vector<8x512xf32> to vector<8x128xf32>
    %140 = math.tanh %139 : vector<8x128xf32>
    %141 = vector.extract_strided_slice %126 {offsets = [0, 384], sizes = [8, 128], strides = [1, 1]} : vector<8x512xf32> to vector<8x128xf32>
    %142 = arith.negf %141 : vector<8x128xf32>
    %143 = math.exp %142 : vector<8x128xf32>
    %cst_40 = arith.constant 1.000000e+00 : f32
    %144 = vector.broadcast %cst_40 : f32 to vector<8x128xf32>
    %145 = arith.addf %144, %143 : vector<8x128xf32>
    %146 = arith.divf %144, %145 : vector<8x128xf32>
    %147 = arith.mulf %138, %119 : vector<8x128xf32>
    %148 = arith.mulf %132, %140 : vector<8x128xf32>
    %149 = arith.addf %147, %148 : vector<8x128xf32>
    %150 = math.tanh %149 : vector<8x128xf32>
    %151 = arith.mulf %146, %150 : vector<8x128xf32>
    %c5 = arith.constant 5 : index
    %c0_41 = arith.constant 0 : index
    %c0_42 = arith.constant 0 : index
    %152 = vector.load %arg0[%c5, %c0_41, %c0_42] : memref<9x8x512xf32, #tpu.memory_space<vmem>>, vector<1x8x512xf32>
    %153 = vector.shape_cast %152 : vector<1x8x512xf32> to vector<8x512xf32>
    %c0_43 = arith.constant 0 : index
    %c0_44 = arith.constant 0 : index
    %154 = vector.load %arg1[%c0_43, %c0_44] : memref<128x512xf32, #tpu.memory_space<vmem>>, vector<128x512xf32>
    %cst_45 = arith.constant dense<0.000000e+00> : vector<8x512xf32>
    %155 = tpu.matmul %151, %154, %cst_45 {dimension_numbers = #tpu.dot_dimension_numbers<[1], [0], [0], [1], [0, 0, 1, 1], [], []>} : vector<8x128xf32>, vector<128x512xf32>, vector<8x512xf32> -> vector<8x512xf32>
    %156 = arith.addf %153, %155 : vector<8x512xf32>
    %157 = vector.extract_strided_slice %156 {offsets = [0, 0], sizes = [8, 128], strides = [1, 1]} : vector<8x512xf32> to vector<8x128xf32>
    %158 = arith.negf %157 : vector<8x128xf32>
    %159 = math.exp %158 : vector<8x128xf32>
    %cst_46 = arith.constant 1.000000e+00 : f32
    %160 = vector.broadcast %cst_46 : f32 to vector<8x128xf32>
    %161 = arith.addf %160, %159 : vector<8x128xf32>
    %162 = arith.divf %160, %161 : vector<8x128xf32>
    %163 = vector.extract_strided_slice %156 {offsets = [0, 128], sizes = [8, 128], strides = [1, 1]} : vector<8x512xf32> to vector<8x128xf32>
    %164 = arith.negf %163 : vector<8x128xf32>
    %165 = math.exp %164 : vector<8x128xf32>
    %cst_47 = arith.constant 1.000000e+00 : f32
    %166 = vector.broadcast %cst_47 : f32 to vector<8x128xf32>
    %167 = arith.addf %166, %165 : vector<8x128xf32>
    %168 = arith.divf %166, %167 : vector<8x128xf32>
    %169 = vector.extract_strided_slice %156 {offsets = [0, 256], sizes = [8, 128], strides = [1, 1]} : vector<8x512xf32> to vector<8x128xf32>
    %170 = math.tanh %169 : vector<8x128xf32>
    %171 = vector.extract_strided_slice %156 {offsets = [0, 384], sizes = [8, 128], strides = [1, 1]} : vector<8x512xf32> to vector<8x128xf32>
    %172 = arith.negf %171 : vector<8x128xf32>
    %173 = math.exp %172 : vector<8x128xf32>
    %cst_48 = arith.constant 1.000000e+00 : f32
    %174 = vector.broadcast %cst_48 : f32 to vector<8x128xf32>
    %175 = arith.addf %174, %173 : vector<8x128xf32>
    %176 = arith.divf %174, %175 : vector<8x128xf32>
    %177 = arith.mulf %168, %149 : vector<8x128xf32>
    %178 = arith.mulf %162, %170 : vector<8x128xf32>
    %179 = arith.addf %177, %178 : vector<8x128xf32>
    %180 = math.tanh %179 : vector<8x128xf32>
    %181 = arith.mulf %176, %180 : vector<8x128xf32>
    %c6 = arith.constant 6 : index
    %c0_49 = arith.constant 0 : index
    %c0_50 = arith.constant 0 : index
    %182 = vector.load %arg0[%c6, %c0_49, %c0_50] : memref<9x8x512xf32, #tpu.memory_space<vmem>>, vector<1x8x512xf32>
    %183 = vector.shape_cast %182 : vector<1x8x512xf32> to vector<8x512xf32>
    %c0_51 = arith.constant 0 : index
    %c0_52 = arith.constant 0 : index
    %184 = vector.load %arg1[%c0_51, %c0_52] : memref<128x512xf32, #tpu.memory_space<vmem>>, vector<128x512xf32>
    %cst_53 = arith.constant dense<0.000000e+00> : vector<8x512xf32>
    %185 = tpu.matmul %181, %184, %cst_53 {dimension_numbers = #tpu.dot_dimension_numbers<[1], [0], [0], [1], [0, 0, 1, 1], [], []>} : vector<8x128xf32>, vector<128x512xf32>, vector<8x512xf32> -> vector<8x512xf32>
    %186 = arith.addf %183, %185 : vector<8x512xf32>
    %187 = vector.extract_strided_slice %186 {offsets = [0, 0], sizes = [8, 128], strides = [1, 1]} : vector<8x512xf32> to vector<8x128xf32>
    %188 = arith.negf %187 : vector<8x128xf32>
    %189 = math.exp %188 : vector<8x128xf32>
    %cst_54 = arith.constant 1.000000e+00 : f32
    %190 = vector.broadcast %cst_54 : f32 to vector<8x128xf32>
    %191 = arith.addf %190, %189 : vector<8x128xf32>
    %192 = arith.divf %190, %191 : vector<8x128xf32>
    %193 = vector.extract_strided_slice %186 {offsets = [0, 128], sizes = [8, 128], strides = [1, 1]} : vector<8x512xf32> to vector<8x128xf32>
    %194 = arith.negf %193 : vector<8x128xf32>
    %195 = math.exp %194 : vector<8x128xf32>
    %cst_55 = arith.constant 1.000000e+00 : f32
    %196 = vector.broadcast %cst_55 : f32 to vector<8x128xf32>
    %197 = arith.addf %196, %195 : vector<8x128xf32>
    %198 = arith.divf %196, %197 : vector<8x128xf32>
    %199 = vector.extract_strided_slice %186 {offsets = [0, 256], sizes = [8, 128], strides = [1, 1]} : vector<8x512xf32> to vector<8x128xf32>
    %200 = math.tanh %199 : vector<8x128xf32>
    %201 = vector.extract_strided_slice %186 {offsets = [0, 384], sizes = [8, 128], strides = [1, 1]} : vector<8x512xf32> to vector<8x128xf32>
    %202 = arith.negf %201 : vector<8x128xf32>
    %203 = math.exp %202 : vector<8x128xf32>
    %cst_56 = arith.constant 1.000000e+00 : f32
    %204 = vector.broadcast %cst_56 : f32 to vector<8x128xf32>
    %205 = arith.addf %204, %203 : vector<8x128xf32>
    %206 = arith.divf %204, %205 : vector<8x128xf32>
    %207 = arith.mulf %198, %179 : vector<8x128xf32>
    %208 = arith.mulf %192, %200 : vector<8x128xf32>
    %209 = arith.addf %207, %208 : vector<8x128xf32>
    %210 = math.tanh %209 : vector<8x128xf32>
    %211 = arith.mulf %206, %210 : vector<8x128xf32>
    %c7 = arith.constant 7 : index
    %c0_57 = arith.constant 0 : index
    %c0_58 = arith.constant 0 : index
    %212 = vector.load %arg0[%c7, %c0_57, %c0_58] : memref<9x8x512xf32, #tpu.memory_space<vmem>>, vector<1x8x512xf32>
    %213 = vector.shape_cast %212 : vector<1x8x512xf32> to vector<8x512xf32>
    %c0_59 = arith.constant 0 : index
    %c0_60 = arith.constant 0 : index
    %214 = vector.load %arg1[%c0_59, %c0_60] : memref<128x512xf32, #tpu.memory_space<vmem>>, vector<128x512xf32>
    %cst_61 = arith.constant dense<0.000000e+00> : vector<8x512xf32>
    %215 = tpu.matmul %211, %214, %cst_61 {dimension_numbers = #tpu.dot_dimension_numbers<[1], [0], [0], [1], [0, 0, 1, 1], [], []>} : vector<8x128xf32>, vector<128x512xf32>, vector<8x512xf32> -> vector<8x512xf32>
    %216 = arith.addf %213, %215 : vector<8x512xf32>
    %217 = vector.extract_strided_slice %216 {offsets = [0, 0], sizes = [8, 128], strides = [1, 1]} : vector<8x512xf32> to vector<8x128xf32>
    %218 = arith.negf %217 : vector<8x128xf32>
    %219 = math.exp %218 : vector<8x128xf32>
    %cst_62 = arith.constant 1.000000e+00 : f32
    %220 = vector.broadcast %cst_62 : f32 to vector<8x128xf32>
    %221 = arith.addf %220, %219 : vector<8x128xf32>
    %222 = arith.divf %220, %221 : vector<8x128xf32>
    %223 = vector.extract_strided_slice %216 {offsets = [0, 128], sizes = [8, 128], strides = [1, 1]} : vector<8x512xf32> to vector<8x128xf32>
    %224 = arith.negf %223 : vector<8x128xf32>
    %225 = math.exp %224 : vector<8x128xf32>
    %cst_63 = arith.constant 1.000000e+00 : f32
    %226 = vector.broadcast %cst_63 : f32 to vector<8x128xf32>
    %227 = arith.addf %226, %225 : vector<8x128xf32>
    %228 = arith.divf %226, %227 : vector<8x128xf32>
    %229 = vector.extract_strided_slice %216 {offsets = [0, 256], sizes = [8, 128], strides = [1, 1]} : vector<8x512xf32> to vector<8x128xf32>
    %230 = math.tanh %229 : vector<8x128xf32>
    %231 = vector.extract_strided_slice %216 {offsets = [0, 384], sizes = [8, 128], strides = [1, 1]} : vector<8x512xf32> to vector<8x128xf32>
    %232 = arith.negf %231 : vector<8x128xf32>
    %233 = math.exp %232 : vector<8x128xf32>
    %cst_64 = arith.constant 1.000000e+00 : f32
    %234 = vector.broadcast %cst_64 : f32 to vector<8x128xf32>
    %235 = arith.addf %234, %233 : vector<8x128xf32>
    %236 = arith.divf %234, %235 : vector<8x128xf32>
    %237 = arith.mulf %228, %209 : vector<8x128xf32>
    %238 = arith.mulf %222, %230 : vector<8x128xf32>
    %239 = arith.addf %237, %238 : vector<8x128xf32>
    %240 = math.tanh %239 : vector<8x128xf32>
    %241 = arith.mulf %236, %240 : vector<8x128xf32>
    %c8 = arith.constant 8 : index
    %c0_65 = arith.constant 0 : index
    %c0_66 = arith.constant 0 : index
    %242 = vector.load %arg0[%c8, %c0_65, %c0_66] : memref<9x8x512xf32, #tpu.memory_space<vmem>>, vector<1x8x512xf32>
    %243 = vector.shape_cast %242 : vector<1x8x512xf32> to vector<8x512xf32>
    %c0_67 = arith.constant 0 : index
    %c0_68 = arith.constant 0 : index
    %244 = vector.load %arg1[%c0_67, %c0_68] : memref<128x512xf32, #tpu.memory_space<vmem>>, vector<128x512xf32>
    %cst_69 = arith.constant dense<0.000000e+00> : vector<8x512xf32>
    %245 = tpu.matmul %241, %244, %cst_69 {dimension_numbers = #tpu.dot_dimension_numbers<[1], [0], [0], [1], [0, 0, 1, 1], [], []>} : vector<8x128xf32>, vector<128x512xf32>, vector<8x512xf32> -> vector<8x512xf32>
    %246 = arith.addf %243, %245 : vector<8x512xf32>
    %247 = vector.extract_strided_slice %246 {offsets = [0, 0], sizes = [8, 128], strides = [1, 1]} : vector<8x512xf32> to vector<8x128xf32>
    %248 = arith.negf %247 : vector<8x128xf32>
    %249 = math.exp %248 : vector<8x128xf32>
    %cst_70 = arith.constant 1.000000e+00 : f32
    %250 = vector.broadcast %cst_70 : f32 to vector<8x128xf32>
    %251 = arith.addf %250, %249 : vector<8x128xf32>
    %252 = arith.divf %250, %251 : vector<8x128xf32>
    %253 = vector.extract_strided_slice %246 {offsets = [0, 128], sizes = [8, 128], strides = [1, 1]} : vector<8x512xf32> to vector<8x128xf32>
    %254 = arith.negf %253 : vector<8x128xf32>
    %255 = math.exp %254 : vector<8x128xf32>
    %cst_71 = arith.constant 1.000000e+00 : f32
    %256 = vector.broadcast %cst_71 : f32 to vector<8x128xf32>
    %257 = arith.addf %256, %255 : vector<8x128xf32>
    %258 = arith.divf %256, %257 : vector<8x128xf32>
    %259 = vector.extract_strided_slice %246 {offsets = [0, 256], sizes = [8, 128], strides = [1, 1]} : vector<8x512xf32> to vector<8x128xf32>
    %260 = math.tanh %259 : vector<8x128xf32>
    %261 = vector.extract_strided_slice %246 {offsets = [0, 384], sizes = [8, 128], strides = [1, 1]} : vector<8x512xf32> to vector<8x128xf32>
    %262 = arith.negf %261 : vector<8x128xf32>
    %263 = math.exp %262 : vector<8x128xf32>
    %cst_72 = arith.constant 1.000000e+00 : f32
    %264 = vector.broadcast %cst_72 : f32 to vector<8x128xf32>
    %265 = arith.addf %264, %263 : vector<8x128xf32>
    %266 = arith.divf %264, %265 : vector<8x128xf32>
    %267 = arith.mulf %258, %239 : vector<8x128xf32>
    %268 = arith.mulf %252, %260 : vector<8x128xf32>
    %269 = arith.addf %267, %268 : vector<8x128xf32>
    %270 = math.tanh %269 : vector<8x128xf32>
    %271 = arith.mulf %266, %270 : vector<8x128xf32>
    %c0_73 = arith.constant 0 : index
    %c0_74 = arith.constant 0 : index
    %272 = vector.load %arg2[%c0_73, %c0_74] : memref<128x128xf32, #tpu.memory_space<vmem>>, vector<128x128xf32>
    %cst_75 = arith.constant dense<0.000000e+00> : vector<8x128xf32>
    %273 = tpu.matmul %271, %272, %cst_75 {dimension_numbers = #tpu.dot_dimension_numbers<[1], [0], [0], [1], [0, 0, 1, 1], [], []>} : vector<8x128xf32>, vector<128x128xf32>, vector<8x128xf32> -> vector<8x128xf32>
    %cst_76 = arith.constant 0.000000e+00 : f32
    %274 = vector.broadcast %cst_76 : f32 to vector<8x128xf32>
    %275 = arith.maximumf %273, %274 : vector<8x128xf32>
    %c0_77 = arith.constant 0 : index
    %c0_78 = arith.constant 0 : index
    %276 = vector.load %arg3[%c0_77, %c0_78] : memref<128x128xf32, #tpu.memory_space<vmem>>, vector<128x128xf32>
    %cst_79 = arith.constant dense<0.000000e+00> : vector<8x128xf32>
    %277 = tpu.matmul %275, %276, %cst_79 {dimension_numbers = #tpu.dot_dimension_numbers<[1], [0], [0], [1], [0, 0, 1, 1], [], []>} : vector<8x128xf32>, vector<128x128xf32>, vector<8x128xf32> -> vector<8x128xf32>
    %cst_80 = arith.constant 0.000000e+00 : f32
    %278 = vector.broadcast %cst_80 : f32 to vector<8x128xf32>
    %279 = arith.maximumf %277, %278 : vector<8x128xf32>
    %c0_81 = arith.constant 0 : index
    %c0_82 = arith.constant 0 : index
    %280 = vector.load %arg4[%c0_81, %c0_82] : memref<1x128xf32, #tpu.memory_space<vmem>>, vector<1x128xf32>
    %281 = vector.broadcast %280 : vector<1x128xf32> to vector<8x128xf32>
    %282 = arith.mulf %279, %281 : vector<8x128xf32>
    %cst_83 = arith.constant dense<0.000000e+00> : vector<8xf32>
    %283 = vector.multi_reduction <add>, %282, %cst_83 [1] : vector<8x128xf32> to vector<8xf32>
    %284 = vector.shape_cast %283 : vector<8xf32> to vector<8x1xf32>
    %285 = arith.negf %284 : vector<8x1xf32>
    %286 = math.exp %285 : vector<8x1xf32>
    %cst_84 = arith.constant 1.000000e+00 : f32
    %287 = vector.broadcast %cst_84 : f32 to vector<8x1xf32>
    %288 = arith.addf %287, %286 : vector<8x1xf32>
    %289 = arith.divf %287, %288 : vector<8x1xf32>
    %290 = vector.shape_cast %289 : vector<8x1xf32> to vector<8x1xf32>
    %291 = vector.broadcast %290 : vector<8x1xf32> to vector<8x128xf32>
    %c0_85 = arith.constant 0 : index
    %c0_86 = arith.constant 0 : index
    %292 = vector.load %arg5[%c0_85, %c0_86] : memref<8x128xf32, #tpu.memory_space<vmem>>, vector<8x128xf32>
    tpu.vector_store %arg5[%c0_85, %c0_86], %291 {strides = array<i32>} : memref<8x128xf32, #tpu.memory_space<vmem>>, vector<8x128xf32>,
    return
  }
}

</mosaic_0001>

<bundles_post_ra>
// kernel: critic_forward.1
= control target key start
LH: loop header
LB: loop body
LE: loop exit
PB: predicated region body
PF: predicated region fallthrough
CT: control target
= control target key end

     0   :  { %v3784_v3 = vmov 0.0   ;;  %vm2233_vm0 = vmmov 0   ;;  %s3776_s1 = inlined_call_operand.vmem [shape: f32[128,512], index: 1, kind: input, shape index: {}]   ;;  %s3777_s0 = inlined_call_operand.vmem [shape: f32[9,8,512], index: 0, kind: input, shape index: {}]   ;;  %s3778_s2 = inlined_call_operand.vmem [shape: f32[128,128], index: 2, kind: input, shape index: {}]   ;;  %s3779_s3 = inlined_call_operand.vmem [shape: f32[128,128], index: 3, kind: input, shape index: {}]   ;;  %s3780_s4 = inlined_call_operand.vmem [shape: f32[1,128], index: 4, kind: input, shape index: {}]   ;;  %s3781_s5 = inlined_call_operand.vmem [shape: f32[8,128], index: 5, kind: output, shape index: {}]  }
   0x1   :  { %v2267_v0 = vld [vmem:[%s3776_s1 + $0x1e8] sm:$0xff]  ;;  %v2272_v1 = vld [vmem:[%s3776_s1 + $0x1e0] sm:$0xff]  ;;  %152 = vmatprep.mubr.f32.mxu0 %v3784_v3  ;;  %223 = vmatprep.mubr.f32.mxu1 %v3784_v3  ;;  %v2314_v9 = vld [vmem:[%s3776_s1 + $0x1f8] sm:$0xff] }
   0x2   :  { %3864 = vst [vmem:[#allocation2_spill] sm:$0xff] %v2267_v0  ;;  %v2277_v2 = vld [vmem:[%s3776_s1 + $0x1c8] sm:$0xff]  ;;  %88 = vmatprep.subr.mxu0 %v2267_v0  ;;  %v2285_v4 = vld [vmem:[%s3776_s1 + $0x1c0] sm:$0xff]  ;;  %3865 = vst [vmem:[#allocation3_spill] sm:$0xff] %v2314_v9  ;;  %159 = vmatprep.subr.mxu1 %v2314_v9 }
   0x3   :  { %89 = vmatpush1.msra.mxu0 %v2272_v1  ;;  %v2291_v5 = vld [vmem:[%s3776_s1 + $0x1a8] sm:$0xff]  ;;  %v2297_v6 = vld [vmem:[%s3776_s1 + $0x1a0] sm:$0xff]  ;;  %v2326_v11 = vld [vmem:[%s3776_s1 + $0x1f0] sm:$0xff] }
   0x4   :  { %90 = vmatprep.subr.mxu0 %v2277_v2  ;;  %v2303_v7 = vld [vmem:[%s3776_s1 + $0x188] sm:$0xff]  ;;  %v2309_v8 = vld [vmem:[%s3776_s1 + $0x180] sm:$0xff]  ;;  %160 = vmatpush1.msra.mxu1 %v2326_v11  ;;  %v2338_v13 = vld [vmem:[%s3776_s1 + $0x1d8] sm:$0xff] }
   0x5   :  { %91 = vmatpush1.msra.mxu0 %v2285_v4  ;;  %v2320_v10 = vld [vmem:[%s3776_s1 + $0x168] sm:$0xff]  ;;  %v2332_v12 = vld [vmem:[%s3776_s1 + $0x160] sm:$0xff]  ;;  %v2343_v14 = vld [vmem:[%s3776_s1 + $0x1d0] sm:$0xff]  ;;  %161 = vmatprep.subr.mxu1 %v2338_v13 }
   0x6   :  { %92 = vmatprep.subr.mxu0 %v2291_v5  ;;  %v2349_v15 = vld [vmem:[%s3776_s1 + $0x148] sm:$0xff]  ;;  %v2355_v16 = vld [vmem:[%s3776_s1 + $0x1b8] sm:$0xff]  ;;  %v2361_v17 = vld [vmem:[%s3776_s1 + $0x140] sm:$0xff]  ;;  %162 = vmatpush1.msra.mxu1 %v2343_v14 }
   0x7   :  { %93 = vmatpush1.msra.mxu0 %v2297_v6  ;;  %v2367_v18 = vld [vmem:[%s3776_s1 + $0x1b0] sm:$0xff]  ;;  %v2372_v19 = vld [vmem:[%s3776_s1 + $0x198] sm:$0xff]  ;;  %v2378_v20 = vld [vmem:[%s3776_s1 + $0x128] sm:$0xff]  ;;  %163 = vmatprep.subr.mxu1 %v2355_v16 }
   0x8   :  { %94 = vmatprep.subr.mxu0 %v2303_v7  ;;  %v2384_v21 = vld [vmem:[%s3776_s1 + $0x190] sm:$0xff]  ;;  %v2390_v22 = vld [vmem:[%s3776_s1 + $0x120] sm:$0xff]  ;;  %164 = vmatpush1.msra.mxu1 %v2367_v18  ;;  %v2396_v23 = vld [vmem:[%s3776_s1 + $0x178] sm:$0xff] }
   0x9   :  { %95 = vmatpush1.msra.mxu0 %v2309_v8  ;;  %v2402_v24 = vld [vmem:[%s3776_s1 + $0x108] sm:$0xff]  ;;  %165 = vmatprep.subr.mxu1 %v2372_v19  ;;  %v2408_v25 = vld [vmem:[%s3776_s1 + $0x170] sm:$0xff]  ;;  %v2414_v26 = vld [vmem:[%s3776_s1 + $0x100] sm:$0xff] }
   0xa   :  { %96 = vmatprep.subr.mxu0 %v2320_v10  ;;  %166 = vmatpush1.msra.mxu1 %v2384_v21  ;;  %v2420_v27 = vld [vmem:[%s3776_s1 + $0x158] sm:$0xff]  ;;  %v2426_v28 = vld [vmem:[%s3776_s1 + $0xe8] sm:$0xff]  ;;  %v2432_v29 = vld [vmem:[%s3776_s1 + $0x150] sm:$0xff] }
   0xb   :  { %97 = vmatpush1.msra.mxu0 %v2332_v12  ;;  %167 = vmatprep.subr.mxu1 %v2396_v23  ;;  %v2438_v30 = vld [vmem:[%s3776_s1 + $0xe0] sm:$0xff]  ;;  %v2444_v31 = vld [vmem:[%s3776_s1 + $0x138] sm:$0xff]  ;;  %v2450_v32 = vld [vmem:[%s3776_s1 + $0xc8] sm:$0xff] }
   0xc   :  { %98 = vmatprep.subr.mxu0 %v2349_v15  ;;  %168 = vmatpush1.msra.mxu1 %v2408_v25  ;;  %v2456_v33 = vld [vmem:[%s3776_s1 + $0x130] sm:$0xff]  ;;  %v2462_v34 = vld [vmem:[%s3776_s1 + $0xc0] sm:$0xff]  ;;  %v2468_v35 = vld [vmem:[%s3776_s1 + $0x118] sm:$0xff] }
   0xd   :  { %99 = vmatpush1.msra.mxu0 %v2361_v17  ;;  %169 = vmatprep.subr.mxu1 %v2420_v27  ;;  %v2474_v36 = vld [vmem:[%s3776_s1 + $0xa8] sm:$0xff]  ;;  %v2480_v37 = vld [vmem:[%s3776_s1 + $0x110] sm:$0xff]  ;;  %v2486_v38 = vld [vmem:[%s3776_s1 + $0xa0] sm:$0xff] }
   0xe   :  { %100 = vmatprep.subr.mxu0 %v2378_v20  ;;  %170 = vmatpush1.msra.mxu1 %v2432_v29  ;;  %v2492_v39 = vld [vmem:[%s3776_s1 + $0xf8] sm:$0xff]  ;;  %v2498_v40 = vld [vmem:[%s3776_s1 + $0x88] sm:$0xff]  ;;  %v2504_v41 = vld [vmem:[%s3776_s1 + $0xf0] sm:$0xff] }
   0xf   :  { %101 = vmatpush1.msra.mxu0 %v2390_v22  ;;  %171 = vmatprep.subr.mxu1 %v2444_v31  ;;  %v2510_v42 = vld [vmem:[%s3776_s1 + $0x80] sm:$0xff]  ;;  %v2516_v43 = vld [vmem:[%s3776_s1 + $0xd8] sm:$0xff]  ;;  %v2522_v44 = vld [vmem:[%s3776_s1 + $0x68] sm:$0xff] }
  0x10   :  { %102 = vmatprep.subr.mxu0 %v2402_v24  ;;  %172 = vmatpush1.msra.mxu1 %v2456_v33  ;;  %3866 = vst [vmem:[#allocation4_spill] sm:$0xff] %v2522_v44  ;;  %v2528_v45 = vld [vmem:[%s3776_s1 + $0xd0] sm:$0xff]  ;;  %v2534_v46 = vld [vmem:[%s3776_s1 + $0x60] sm:$0xff]  ;;  %v2540_v47 = vld [vmem:[%s3776_s1 + $0xb8] sm:$0xff] }
  0x11   :  { %103 = vmatpush1.msra.mxu0 %v2414_v26  ;;  %173 = vmatprep.subr.mxu1 %v2468_v35  ;;  %3867 = vst [vmem:[#allocation5_spill] sm:$0xff] %v2534_v46  ;;  %v2546_v48 = vld [vmem:[%s3776_s1 + $0x48] sm:$0xff]  ;;  %v2552_v49 = vld [vmem:[%s3776_s1 + $0xb0] sm:$0xff]  ;;  %v2558_v50 = vld [vmem:[%s3776_s1 + $0x40] sm:$0xff] }
  0x12   :  { %104 = vmatprep.subr.mxu0 %v2426_v28  ;;  %174 = vmatpush1.msra.mxu1 %v2480_v37  ;;  %3868 = vst [vmem:[#allocation6_spill] sm:$0xff] %v2546_v48  ;;  %3869 = vst [vmem:[#allocation7_spill] sm:$0xff] %v2558_v50  ;;  %v2564_v51 = vld [vmem:[%s3776_s1 + $0x98] sm:$0xff]  ;;  %v2570_v52 = vld [vmem:[%s3776_s1 + $0x28] sm:$0xff] }
  0x13   :  { %105 = vmatpush1.msra.mxu0 %v2438_v30  ;;  %175 = vmatprep.subr.mxu1 %v2492_v39  ;;  %3870 = vst [vmem:[#allocation8_spill] sm:$0xff] %v2570_v52  ;;  %v2576_v53 = vld [vmem:[%s3776_s1 + $0x90] sm:$0xff]  ;;  %v2582_v54 = vld [vmem:[%s3776_s1 + $0x20] sm:$0xff]  ;;  %v2588_v55 = vld [vmem:[%s3776_s1 + $0x78] sm:$0xff] }
  0x14   :  { %106 = vmatprep.subr.mxu0 %v2450_v32  ;;  %176 = vmatpush1.msra.mxu1 %v2504_v41  ;;  %3871 = vst [vmem:[#allocation9_spill] sm:$0xff] %v2576_v53  ;;  %3872 = vst [vmem:[#allocation10_spill] sm:$0xff] %v2582_v54  ;;  %v2594_v56 = vld [vmem:[%s3776_s1 + $0x8] sm:$0xff]  ;;  %v2600_v57 = vld [vmem:[%s3776_s1 + $0x70] sm:$0xff] }
  0x15   :  { %107 = vmatpush1.msra.mxu0 %v2462_v34  ;;  %177 = vmatprep.subr.mxu1 %v2516_v43  ;;  %3873 = vst [vmem:[#allocation11_spill] sm:$0xff] %v2588_v55  ;;  %3874 = vst [vmem:[#allocation12_spill] sm:$0xff] %v2594_v56  ;;  %v2606_v58 = vld [vmem:[%s3776_s1] sm:$0xff]  ;;  %v2612_v59 = vld [vmem:[%s3776_s1 + $0x58] sm:$0xff] }
  0x16   :  { %108 = vmatprep.subr.mxu0 %v2474_v36  ;;  %178 = vmatpush1.msra.mxu1 %v2528_v45  ;;  %3875 = vst [vmem:[#allocation13_spill] sm:$0xff] %v2600_v57  ;;  %3876 = vst [vmem:[#allocation14_spill] sm:$0xff] %v2606_v58  ;;  %v2619_v60 = vld [vmem:[%s3776_s1 + $0x50] sm:$0xff]  ;;  %v2626_v61 = vld [vmem:[%s3776_s1 + $0x38] sm:$0xff] }
  0x17   :  { %109 = vmatpush1.msra.mxu0 %v2486_v38  ;;  %179 = vmatprep.subr.mxu1 %v2540_v47  ;;  %3877 = vst [vmem:[#allocation15_spill] sm:$0xff] %v2612_v59  ;;  %3878 = vst [vmem:[#allocation16_spill] sm:$0xff] %v2619_v60  ;;  %v2633_v62 = vld [vmem:[%s3776_s1 + $0x30] sm:$0xff]  ;;  %v2640_v63 = vld [vmem:[%s3776_s1 + $0x18] sm:$0xff] }
  0x18   :  { %110 = vmatprep.subr.mxu0 %v2498_v40  ;;  %180 = vmatpush1.msra.mxu1 %v2552_v49  ;;  %3879 = vst [vmem:[#allocation17_spill] sm:$0xff] %v2626_v61  ;;  %3880 = vst [vmem:[#allocation18_spill] sm:$0xff] %v2633_v62 }
  0x19   :  { %111 = vmatpush1.msra.mxu0 %v2510_v42  ;;  %181 = vmatprep.subr.mxu1 %v2564_v51  ;;  %3881 = vst [vmem:[#allocation19_spill] sm:$0xff] %v2640_v63 }
  0x1a   :  { %112 = vmatprep.subr.mxu0 %v2522_v44  ;;  %182 = vmatpush1.msra.mxu1 %v2576_v53 }
  0x1b   :  { %113 = vmatpush1.msra.mxu0 %v2534_v46  ;;  %183 = vmatprep.subr.mxu1 %v2588_v55 }
  0x1c   :  { %114 = vmatprep.subr.mxu0 %v2546_v48  ;;  %184 = vmatpush1.msra.mxu1 %v2600_v57 }
  0x1d   :  { %115 = vmatpush1.msra.mxu0 %v2558_v50  ;;  %185 = vmatprep.subr.mxu1 %v2612_v59 }
  0x1e   :  { %116 = vmatprep.subr.mxu0 %v2570_v52  ;;  %186 = vmatpush1.msra.mxu1 %v2619_v60 }
  0x1f   :  { %117 = vmatpush1.msra.mxu0 %v2582_v54  ;;  %187 = vmatprep.subr.mxu1 %v2626_v61 }
  0x20   :  { %118 = vmatprep.subr.mxu0 %v2594_v56  ;;  %188 = vmatpush1.msra.mxu1 %v2633_v62 }
  0x21   :  { %119 = vmatpush1.msra.mxu0 %v2606_v58  ;;  %v2646_v58 = vld [vmem:[%s3776_s1 + $0x10] sm:$0xff]  ;;  %189 = vmatprep.subr.mxu1 %v2640_v63 }
  0x22   :  { %153 = vmatmul.mubr.f32.vlgmr.msra.gmra.mxu0 %v3784_v3  ;;  %3882 = vst [vmem:[#allocation20_spill] sm:$0xff] %v2646_v58  ;;  %263 = vmatprep.subr.mxu0 %v2267_v0 }
  0x23   :  { %264 = vmatpush1.msra.mxu0 %v2272_v1  ;;  %190 = vmatpush1.msra.mxu1 %v2646_v58 }
  0x24   :  { %265 = vmatprep.subr.mxu0 %v2277_v2  ;;  %224 = vmatmul.mubr.f32.vlgmr.msra.gmra.mxu1 %v3784_v3  ;;  %v3883_v3 = vld [vmem:[#allocation14_spill] sm:$0xff] }
  0x25   :  { %266 = vmatpush1.msra.mxu0 %v2285_v4  ;;  %334 = vmatprep.subr.mxu1 %v2314_v9 }
  0x26   :  { %335 = vmatpush1.msra.mxu1 %v2326_v11  ;;  %267 = vmatprep.subr.mxu0 %v2291_v5 }
  0x27   :  { %336 = vmatprep.subr.mxu1 %v2338_v13  ;;  %268 = vmatpush1.msra.mxu0 %v2297_v6 }
  0x28   :  { %337 = vmatpush1.msra.mxu1 %v2343_v14  ;;  %269 = vmatprep.subr.mxu0 %v2303_v7 }
  0x29   :  { %338 = vmatprep.subr.mxu1 %v2355_v16  ;;  %270 = vmatpush1.msra.mxu0 %v2309_v8 }
  0x2a   :  { %339 = vmatpush1.msra.mxu1 %v2367_v18  ;;  %271 = vmatprep.subr.mxu0 %v2320_v10 }
  0x2b   :  { %340 = vmatprep.subr.mxu1 %v2372_v19  ;;  %272 = vmatpush1.msra.mxu0 %v2332_v12 }
  0x2c   :  { %341 = vmatpush1.msra.mxu1 %v2384_v21  ;;  %273 = vmatprep.subr.mxu0 %v2349_v15 }
  0x2d   :  { %342 = vmatprep.subr.mxu1 %v2396_v23  ;;  %274 = vmatpush1.msra.mxu0 %v2361_v17 }
  0x2e   :  { %343 = vmatpush1.msra.mxu1 %v2408_v25  ;;  %275 = vmatprep.subr.mxu0 %v2378_v20 }
  0x2f   :  { %344 = vmatprep.subr.mxu1 %v2420_v27  ;;  %276 = vmatpush1.msra.mxu0 %v2390_v22 }
  0x30   :  { %345 = vmatpush1.msra.mxu1 %v2432_v29  ;;  %277 = vmatprep.subr.mxu0 %v2402_v24 }
  0x31   :  { %346 = vmatprep.subr.mxu1 %v2444_v31  ;;  %278 = vmatpush1.msra.mxu0 %v2414_v26 }
  0x32   :  { %347 = vmatpush1.msra.mxu1 %v2456_v33  ;;  %279 = vmatprep.subr.mxu0 %v2426_v28 }
  0x33   :  { %348 = vmatprep.subr.mxu1 %v2468_v35  ;;  %280 = vmatpush1.msra.mxu0 %v2438_v30 }
  0x34   :  { %349 = vmatpush1.msra.mxu1 %v2480_v37  ;;  %281 = vmatprep.subr.mxu0 %v2450_v32 }
  0x35   :  { %350 = vmatprep.subr.mxu1 %v2492_v39  ;;  %282 = vmatpush1.msra.mxu0 %v2462_v34 }
  0x36   :  { %351 = vmatpush1.msra.mxu1 %v2504_v41  ;;  %283 = vmatprep.subr.mxu0 %v2474_v36 }
  0x37   :  { %352 = vmatprep.subr.mxu1 %v2516_v43  ;;  %284 = vmatpush1.msra.mxu0 %v2486_v38 }
  0x38   :  { %353 = vmatpush1.msra.mxu1 %v2528_v45  ;;  %285 = vmatprep.subr.mxu0 %v2498_v40 }
  0x39   :  { %354 = vmatprep.subr.mxu1 %v2540_v47  ;;  %286 = vmatpush1.msra.mxu0 %v2510_v42 }
  0x3a   :  { %355 = vmatpush1.msra.mxu1 %v2552_v49  ;;  %287 = vmatprep.subr.mxu0 %v2522_v44 }
  0x3b   :  { %356 = vmatprep.subr.mxu1 %v2564_v51  ;;  %288 = vmatpush1.msra.mxu0 %v2534_v46 }
  0x3c   :  { %357 = vmatpush1.msra.mxu1 %v2576_v53  ;;  %289 = vmatprep.subr.mxu0 %v2546_v48  ;;  %v3884_v48 = vmov 0.0  }
  0x3d   :  { %358 = vmatprep.subr.mxu1 %v2588_v55  ;;  %290 = vmatpush1.msra.mxu0 %v2558_v50 }
  0x3e   :  { %359 = vmatpush1.msra.mxu1 %v2600_v57  ;;  %291 = vmatprep.subr.mxu0 %v2570_v52 }
  0x3f   :  { %360 = vmatprep.subr.mxu1 %v2612_v59  ;;  %292 = vmatpush1.msra.mxu0 %v2582_v54 }
  0x40   :  { %361 = vmatpush1.msra.mxu1 %v2619_v60  ;;  %293 = vmatprep.subr.mxu0 %v2594_v56  ;;  %v20_v56 = vld [vmem:[%s3777_s0] sm:$0xff]  ;;  %v22_v60 = vld [vmem:[%s3777_s0 + $0x10] sm:$0xff] }
  0x41   :  { %362 = vmatprep.subr.mxu1 %v2626_v61  ;;  %294 = vmatpush1.msra.mxu0 %v3883_v3  ;;  %v21_v3 = vld [vmem:[%s3777_s0 + $0x8] sm:$0xff] }
  0x42   :  { %363 = vmatpush1.msra.mxu1 %v2633_v62  ;;  %327 = vmatprep.mubr.f32.mxu0 %v3884_v48 }
  0x43   :  { %364 = vmatprep.subr.mxu1 %v2640_v63  ;;  %398 = vmatprep.mubr.f32.mxu1 %v3884_v48 }
  0x44   :  { %365 = vmatpush1.msra.mxu1 %v2646_v58  ;;  %438 = vmatprep.subr.mxu0 %v2267_v0 }
  0x45   :  { %509 = vmatprep.subr.mxu1 %v2314_v9  ;;  %v23_v9 = vld [vmem:[%s3777_s0 + $0x18] sm:$0xff] }
  0xe2   :  { %v154_v54 = vpop.f32.mrf.mxu0 }
  0xe3   :  { %v230_v62 = vadd.f32 %v154_v54, %v20_v56 }
  0xe4   :  { %v156_v61 = vpop.f32.mrf.mxu0  ;;  %v225_v58 = vpop.f32.mrf.mxu1 }
  0xe5   :  { %v1853_v63 = vmul.f32 -1.442695, %v230_v62  ;;  %v231_v52 = vadd.f32 %v156_v61, %v21_v3  ;;  %v232_v59 = vadd.f32 %v225_v58, %v22_v60  ;;  %v3889_v58 = vld [vmem:[#allocation13_spill] sm:$0xff]  ;;  %v3891_v60 = vld [vmem:[#allocation15_spill] sm:$0xff] }
  0xe6   :  { %v227_v0 = vpop.f32.mrf.mxu1 }
  0xe7   :  { %2020 = vpow2.f32 %v1853_v63  ;;  %v1854_v48 = vmul.f32 -1.442695, %v231_v52  ;;  %v233_v50 = vadd.f32 %v227_v0, %v23_v9 }
  0xe9   :  { %2022 = vpow2.f32 %v1854_v48  ;;  %v1855_v57 = vmul.f32 -1.442695, %v233_v50 }
  0xea   :  { %2024 = vtanh.f32 %v232_v59  ;;  %v3890_v59 = vld [vmem:[#allocation6_spill] sm:$0xff] }
  0xeb   :  { %2026 = vpow2.f32 %v1855_v57  ;;  %v3888_v57 = vld [vmem:[#allocation5_spill] sm:$0xff] }
  0xf4   :  { %v2021_v54 = vpop.eup %2020 }
  0xf5   :  { %v237_v56 = vadd.f32 1.0, %v2021_v54  ;;  %v3892_v54 = vld [vmem:[#allocation7_spill] sm:$0xff] }
  0xf6   :  { %v2023_v3 = vpop.eup %2022 }
  0xf7   :  { %2028 = vrcp.f32 %v237_v56  ;;  %v243_v52 = vadd.f32 1.0, %v2023_v3  ;;  %v2025_v48 = vpop.eup %2024  ;;  %v3893_v56 = vld [vmem:[#allocation16_spill] sm:$0xff] }
  0xf8   :  { %v2027_v61 = vpop.eup %2026  ;;  %v3894_v3 = vld [vmem:[#allocation8_spill] sm:$0xff] }
  0xf9   :  { %2030 = vrcp.f32 %v243_v52  ;;  %v250_v46 = vadd.f32 1.0, %v2027_v61  ;;  %v3895_v52 = vld [vmem:[#allocation17_spill] sm:$0xff]  ;;  %v3897_v61 = vld [vmem:[#allocation18_spill] sm:$0xff] }
  0xfb   :  { %2032 = vrcp.f32 %v250_v46  ;;  %v3886_v46 = vld [vmem:[#allocation4_spill] sm:$0xff] }
 0x104   :  { %v2029_v62 = vpop.eup %2028 }
 0x105   :  { %v254_v44 = vmul.f32 %v2029_v62, %v2025_v48  ;;  %v3896_v48 = vld [vmem:[#allocation10_spill] sm:$0xff]  ;;  %v3898_v62 = vld [vmem:[#allocation12_spill] sm:$0xff] }
 0x106   :  { %v2031_v63 = vpop.eup %2030 }
 0x107   :  { %v253_v55 = vmul.f32 0.0, %v2031_v63  ;;  %v3899_v63 = vld [vmem:[#allocation19_spill] sm:$0xff] }
 0x108   :  { %v2033_v0 = vpop.eup %2032 }
 0x109   :  { %v2732_v53 = vadd.f32 %v254_v44, %v253_v55  ;;  %v3885_v44 = vld [vmem:[#allocation9_spill] sm:$0xff]  ;;  %v3887_v55 = vld [vmem:[#allocation11_spill] sm:$0xff] }
 0x10b   :  { %2034 = vtanh.f32 %v2732_v53 }
 0x118   :  { %v2035_v9 = vpop.eup %2034 }
 0x119   :  { %v257_v50 = vmul.f32 %v2035_v9, %v2033_v0  ;;  %v3900_v0 = vld [vmem:[#allocation14_spill] sm:$0xff]  ;;  %v3901_v9 = vmov 0.0  }
 0x11b   :  { %328 = vmatmul.mubr.f32.vlgmr.msra.gmra.mxu0 %v257_v50  ;;  %399 = vmatmul.mubr.f32.vlgmr.msra.gmra.mxu1 %v257_v50  ;;  %v3902_v50 = vld [vmem:[#allocation20_spill] sm:$0xff] }
 0x11c   :  { %439 = vmatpush1.msra.mxu0 %v2272_v1  ;;  %510 = vmatpush1.msra.mxu1 %v2326_v11 }
 0x11d   :  { %440 = vmatprep.subr.mxu0 %v2277_v2  ;;  %511 = vmatprep.subr.mxu1 %v2338_v13 }
 0x11e   :  { %441 = vmatpush1.msra.mxu0 %v2285_v4  ;;  %512 = vmatpush1.msra.mxu1 %v2343_v14 }
 0x11f   :  { %442 = vmatprep.subr.mxu0 %v2291_v5  ;;  %513 = vmatprep.subr.mxu1 %v2355_v16 }
 0x120   :  { %443 = vmatpush1.msra.mxu0 %v2297_v6  ;;  %514 = vmatpush1.msra.mxu1 %v2367_v18 }
 0x121   :  { %444 = vmatprep.subr.mxu0 %v2303_v7  ;;  %515 = vmatprep.subr.mxu1 %v2372_v19 }
 0x122   :  { %445 = vmatpush1.msra.mxu0 %v2309_v8  ;;  %516 = vmatpush1.msra.mxu1 %v2384_v21 }
 0x123   :  { %446 = vmatprep.subr.mxu0 %v2320_v10  ;;  %517 = vmatprep.subr.mxu1 %v2396_v23 }
 0x124   :  { %447 = vmatpush1.msra.mxu0 %v2332_v12  ;;  %518 = vmatpush1.msra.mxu1 %v2408_v25 }
 0x125   :  { %448 = vmatprep.subr.mxu0 %v2349_v15  ;;  %519 = vmatprep.subr.mxu1 %v2420_v27 }
 0x126   :  { %449 = vmatpush1.msra.mxu0 %v2361_v17  ;;  %520 = vmatpush1.msra.mxu1 %v2432_v29 }
 0x127   :  { %450 = vmatprep.subr.mxu0 %v2378_v20  ;;  %521 = vmatprep.subr.mxu1 %v2444_v31 }
 0x128   :  { %451 = vmatpush1.msra.mxu0 %v2390_v22  ;;  %522 = vmatpush1.msra.mxu1 %v2456_v33 }
 0x129   :  { %452 = vmatprep.subr.mxu0 %v2402_v24  ;;  %523 = vmatprep.subr.mxu1 %v2468_v35 }
 0x12a   :  { %453 = vmatpush1.msra.mxu0 %v2414_v26  ;;  %524 = vmatpush1.msra.mxu1 %v2480_v37 }
 0x12b   :  { %454 = vmatprep.subr.mxu0 %v2426_v28  ;;  %525 = vmatprep.subr.mxu1 %v2492_v39 }
 0x12c   :  { %455 = vmatpush1.msra.mxu0 %v2438_v30  ;;  %526 = vmatpush1.msra.mxu1 %v2504_v41 }
 0x12d   :  { %456 = vmatprep.subr.mxu0 %v2450_v32  ;;  %527 = vmatprep.subr.mxu1 %v2516_v43 }
 0x12e   :  { %457 = vmatpush1.msra.mxu0 %v2462_v34  ;;  %528 = vmatpush1.msra.mxu1 %v2528_v45 }
 0x12f   :  { %458 = vmatprep.subr.mxu0 %v2474_v36  ;;  %529 = vmatprep.subr.mxu1 %v2540_v47 }
 0x130   :  { %459 = vmatpush1.msra.mxu0 %v2486_v38  ;;  %530 = vmatpush1.msra.mxu1 %v2552_v49 }
 0x131   :  { %460 = vmatprep.subr.mxu0 %v2498_v40  ;;  %531 = vmatprep.subr.mxu1 %v2564_v51 }
 0x132   :  { %461 = vmatpush1.msra.mxu0 %v2510_v42  ;;  %532 = vmatpush1.msra.mxu1 %v3885_v44 }
 0x133   :  { %462 = vmatprep.subr.mxu0 %v3886_v46  ;;  %533 = vmatprep.subr.mxu1 %v3887_v55 }
 0x134   :  { %463 = vmatpush1.msra.mxu0 %v3888_v57  ;;  %534 = vmatpush1.msra.mxu1 %v3889_v58 }
 0x135   :  { %464 = vmatprep.subr.mxu0 %v3890_v59  ;;  %535 = vmatprep.subr.mxu1 %v3891_v60  ;;  %v1858_v59 = vld [vmem:[%s3777_s0 + $0x30] sm:$0xff] }
 0x136   :  { %465 = vmatpush1.msra.mxu0 %v3892_v54  ;;  %536 = vmatpush1.msra.mxu1 %v3893_v56  ;;  %v3903_v56 = vld [vmem:[#allocation2_spill] sm:$0xff] }
 0x137   :  { %466 = vmatprep.subr.mxu0 %v3894_v3  ;;  %537 = vmatprep.subr.mxu1 %v3895_v52  ;;  %v3904_v3 = vld [vmem:[#allocation3_spill] sm:$0xff] }
 0x138   :  { %467 = vmatpush1.msra.mxu0 %v3896_v48  ;;  %538 = vmatpush1.msra.mxu1 %v3897_v61  ;;  %v1856_v61 = vld [vmem:[%s3777_s0 + $0x20] sm:$0xff] }
 0x139   :  { %468 = vmatprep.subr.mxu0 %v3898_v62  ;;  %539 = vmatprep.subr.mxu1 %v3899_v63  ;;  %v1857_v63 = vld [vmem:[%s3777_s0 + $0x28] sm:$0xff] }
 0x13a   :  { %469 = vmatpush1.msra.mxu0 %v3900_v0  ;;  %502 = vmatprep.mubr.f32.mxu0 %v3901_v9 }
 0x13b   :  { %540 = vmatpush1.msra.mxu1 %v3902_v50  ;;  %573 = vmatprep.mubr.f32.mxu1 %v3901_v9 }
 0x13c   :  { %613 = vmatprep.subr.mxu0 %v3903_v56  ;;  %684 = vmatprep.subr.mxu1 %v3904_v3  ;;  %v1859_v3 = vld [vmem:[%s3777_s0 + $0x38] sm:$0xff] }
 0x1db   :  { %v329_v48 = vpop.f32.mrf.mxu0  ;;  %v400_v50 = vpop.f32.mrf.mxu1 }
 0x1dc   :  { %v405_v0 = vadd.f32 %v1856_v61, %v329_v48  ;;  %v407_v48 = vadd.f32 %v1858_v59, %v400_v50  ;;  %v3908_v50 = vld [vmem:[#allocation13_spill] sm:$0xff] }
 0x1dd   :  { %v331_v62 = vpop.f32.mrf.mxu0  ;;  %v402_v56 = vpop.f32.mrf.mxu1 }
 0x1de   :  { %v1860_v52 = vmul.f32 -1.442695, %v405_v0  ;;  %v406_v54 = vadd.f32 %v1857_v63, %v331_v62  ;;  %v408_v60 = vadd.f32 %v1859_v3, %v402_v56 }
 0x1e0   :  { %2036 = vpow2.f32 %v1860_v52  ;;  %v1861_v9 = vmul.f32 -1.442695, %v406_v54  ;;  %v1862_v58 = vmul.f32 -1.442695, %v408_v60  ;;  %v3907_v60 = vld [vmem:[#allocation5_spill] sm:$0xff] }
 0x1e2   :  { %2038 = vpow2.f32 %v1861_v9 }
 0x1e3   :  { %2040 = vpow2.f32 %v1862_v58 }
 0x1ed   :  { %v2037_v57 = vpop.eup %2036 }
 0x1ee   :  { %v412_v61 = vadd.f32 1.0, %v2037_v57 }
 0x1ef   :  { %v2039_v0 = vpop.eup %2038 }
 0x1f0   :  { %2042 = vrcp.f32 %v412_v61  ;;  %v418_v52 = vadd.f32 1.0, %v2039_v0  ;;  %v2041_v54 = vpop.eup %2040  ;;  %v3910_v61 = vld [vmem:[#allocation15_spill] sm:$0xff] }
 0x1f1   :  { %2044 = vtanh.f32 %v407_v48  ;;  %v425_v55 = vadd.f32 1.0, %v2041_v54  ;;  %v3909_v48 = vld [vmem:[#allocation6_spill] sm:$0xff]  ;;  %v3911_v0 = vld [vmem:[#allocation7_spill] sm:$0xff]  ;;  %v3913_v54 = vld [vmem:[#allocation8_spill] sm:$0xff] }
 0x1f2   :  { %2046 = vrcp.f32 %v418_v52  ;;  %v3912_v52 = vld [vmem:[#allocation16_spill] sm:$0xff] }
 0x1f3   :  { %2048 = vrcp.f32 %v425_v55  ;;  %v3906_v55 = vld [vmem:[#allocation11_spill] sm:$0xff] }
 0x1fd   :  { %v2043_v62 = vpop.eup %2042 }
 0x1fe   :  { %v2045_v63 = vpop.eup %2044 }
 0x1ff   :  { %v2047_v9 = vpop.eup %2046  ;;  %v429_v56 = vmul.f32 %v2045_v63, %v2043_v62  ;;  %v3914_v62 = vld [vmem:[#allocation17_spill] sm:$0xff]  ;;  %v3915_v63 = vld [vmem:[#allocation10_spill] sm:$0xff] }
 0x200   :  { %v428_v3 = vmul.f32 %v2047_v9, %v2732_v53  ;;  %v2049_v57 = vpop.eup %2048  ;;  %v3905_v53 = vld [vmem:[#allocation4_spill] sm:$0xff]  ;;  %v3916_v9 = vld [vmem:[#allocation18_spill] sm:$0xff] }
 0x202   :  { %v2814_v46 = vadd.f32 %v429_v56, %v428_v3  ;;  %v3917_v56 = vld [vmem:[#allocation12_spill] sm:$0xff]  ;;  %v3918_v3 = vld [vmem:[#allocation19_spill] sm:$0xff] }
 0x204   :  { %2050 = vtanh.f32 %v2814_v46 }
 0x211   :  { %v2051_v59 = vpop.eup %2050 }
 0x212   :  { %v432_v58 = vmul.f32 %v2051_v59, %v2049_v57  ;;  %v3919_v57 = vld [vmem:[#allocation14_spill] sm:$0xff]  ;;  %v3920_v59 = vmov 0.0  }
 0x214   :  { %503 = vmatmul.mubr.f32.vlgmr.msra.gmra.mxu0 %v432_v58  ;;  %574 = vmatmul.mubr.f32.vlgmr.msra.gmra.mxu1 %v432_v58  ;;  %v3921_v58 = vld [vmem:[#allocation20_spill] sm:$0xff] }
 0x215   :  { %614 = vmatpush1.msra.mxu0 %v2272_v1  ;;  %685 = vmatpush1.msra.mxu1 %v2326_v11 }
 0x216   :  { %615 = vmatprep.subr.mxu0 %v2277_v2  ;;  %686 = vmatprep.subr.mxu1 %v2338_v13 }
 0x217   :  { %616 = vmatpush1.msra.mxu0 %v2285_v4  ;;  %687 = vmatpush1.msra.mxu1 %v2343_v14 }
 0x218   :  { %617 = vmatprep.subr.mxu0 %v2291_v5  ;;  %688 = vmatprep.subr.mxu1 %v2355_v16 }
 0x219   :  { %618 = vmatpush1.msra.mxu0 %v2297_v6  ;;  %689 = vmatpush1.msra.mxu1 %v2367_v18 }
 0x21a   :  { %619 = vmatprep.subr.mxu0 %v2303_v7  ;;  %690 = vmatprep.subr.mxu1 %v2372_v19 }
 0x21b   :  { %620 = vmatpush1.msra.mxu0 %v2309_v8  ;;  %691 = vmatpush1.msra.mxu1 %v2384_v21 }
 0x21c   :  { %621 = vmatprep.subr.mxu0 %v2320_v10  ;;  %692 = vmatprep.subr.mxu1 %v2396_v23 }
 0x21d   :  { %622 = vmatpush1.msra.mxu0 %v2332_v12  ;;  %693 = vmatpush1.msra.mxu1 %v2408_v25 }
 0x21e   :  { %623 = vmatprep.subr.mxu0 %v2349_v15  ;;  %694 = vmatprep.subr.mxu1 %v2420_v27 }
 0x21f   :  { %624 = vmatpush1.msra.mxu0 %v2361_v17  ;;  %695 = vmatpush1.msra.mxu1 %v2432_v29 }
 0x220   :  { %625 = vmatprep.subr.mxu0 %v2378_v20  ;;  %696 = vmatprep.subr.mxu1 %v2444_v31 }
 0x221   :  { %626 = vmatpush1.msra.mxu0 %v2390_v22  ;;  %697 = vmatpush1.msra.mxu1 %v2456_v33 }
 0x222   :  { %627 = vmatprep.subr.mxu0 %v2402_v24  ;;  %698 = vmatprep.subr.mxu1 %v2468_v35 }
 0x223   :  { %628 = vmatpush1.msra.mxu0 %v2414_v26  ;;  %699 = vmatpush1.msra.mxu1 %v2480_v37 }
 0x224   :  { %629 = vmatprep.subr.mxu0 %v2426_v28  ;;  %700 = vmatprep.subr.mxu1 %v2492_v39 }
 0x225   :  { %630 = vmatpush1.msra.mxu0 %v2438_v30  ;;  %701 = vmatpush1.msra.mxu1 %v2504_v41 }
 0x226   :  { %631 = vmatprep.subr.mxu0 %v2450_v32  ;;  %702 = vmatprep.subr.mxu1 %v2516_v43 }
 0x227   :  { %632 = vmatpush1.msra.mxu0 %v2462_v34  ;;  %703 = vmatpush1.msra.mxu1 %v2528_v45 }
 0x228   :  { %633 = vmatprep.subr.mxu0 %v2474_v36  ;;  %704 = vmatprep.subr.mxu1 %v2540_v47 }
 0x229   :  { %634 = vmatpush1.msra.mxu0 %v2486_v38  ;;  %705 = vmatpush1.msra.mxu1 %v2552_v49 }
 0x22a   :  { %635 = vmatprep.subr.mxu0 %v2498_v40  ;;  %706 = vmatprep.subr.mxu1 %v2564_v51 }
 0x22b   :  { %636 = vmatpush1.msra.mxu0 %v2510_v42  ;;  %707 = vmatpush1.msra.mxu1 %v3885_v44 }
 0x22c   :  { %637 = vmatprep.subr.mxu0 %v3905_v53  ;;  %708 = vmatprep.subr.mxu1 %v3906_v55 }
 0x22d   :  { %638 = vmatpush1.msra.mxu0 %v3907_v60  ;;  %709 = vmatpush1.msra.mxu1 %v3908_v50 }
 0x22e   :  { %639 = vmatprep.subr.mxu0 %v3909_v48  ;;  %710 = vmatprep.subr.mxu1 %v3910_v61  ;;  %v1865_v48 = vld [vmem:[%s3777_s0 + $0x50] sm:$0xff] }
 0x22f   :  { %640 = vmatpush1.msra.mxu0 %v3911_v0  ;;  %711 = vmatpush1.msra.mxu1 %v3912_v52  ;;  %v3922_v52 = vld [vmem:[#allocation2_spill] sm:$0xff] }
 0x230   :  { %641 = vmatprep.subr.mxu0 %v3913_v54  ;;  %712 = vmatprep.subr.mxu1 %v3914_v62  ;;  %v3923_v54 = vld [vmem:[#allocation3_spill] sm:$0xff] }
 0x231   :  { %642 = vmatpush1.msra.mxu0 %v3915_v63  ;;  %713 = vmatpush1.msra.mxu1 %v3916_v9  ;;  %v1863_v9 = vld [vmem:[%s3777_s0 + $0x40] sm:$0xff] }
 0x232   :  { %643 = vmatprep.subr.mxu0 %v3917_v56  ;;  %714 = vmatprep.subr.mxu1 %v3918_v3  ;;  %v1864_v3 = vld [vmem:[%s3777_s0 + $0x48] sm:$0xff] }
 0x233   :  { %644 = vmatpush1.msra.mxu0 %v3919_v57  ;;  %677 = vmatprep.mubr.f32.mxu0 %v3920_v59 }
 0x234   :  { %715 = vmatpush1.msra.mxu1 %v3921_v58  ;;  %748 = vmatprep.mubr.f32.mxu1 %v3920_v59 }
 0x235   :  { %788 = vmatprep.subr.mxu0 %v3922_v52  ;;  %859 = vmatprep.subr.mxu1 %v3923_v54  ;;  %v1866_v52 = vld [vmem:[%s3777_s0 + $0x58] sm:$0xff] }
 0x2d4   :  { %v504_v63 = vpop.f32.mrf.mxu0  ;;  %v575_v58 = vpop.f32.mrf.mxu1 }
 0x2d5   :  { %v580_v57 = vadd.f32 %v1863_v9, %v504_v63  ;;  %v582_v63 = vadd.f32 %v1865_v48, %v575_v58 }
 0x2d6   :  { %v506_v56 = vpop.f32.mrf.mxu0  ;;  %v577_v54 = vpop.f32.mrf.mxu1 }
 0x2d7   :  { %v1867_v62 = vmul.f32 -1.442695, %v580_v57  ;;  %v581_v0 = vadd.f32 %v1864_v3, %v506_v56  ;;  %v583_v61 = vadd.f32 %v1866_v52, %v577_v54 }
 0x2d9   :  { %2052 = vpow2.f32 %v1867_v62  ;;  %v1868_v59 = vmul.f32 -1.442695, %v581_v0  ;;  %v1869_v50 = vmul.f32 -1.442695, %v583_v61 }
 0x2db   :  { %2054 = vpow2.f32 %v1868_v59 }
 0x2dc   :  { %2056 = vpow2.f32 %v1869_v50 }
 0x2e6   :  { %v2053_v60 = vpop.eup %2052 }
 0x2e7   :  { %v587_v9 = vadd.f32 1.0, %v2053_v60 }
 0x2e8   :  { %v2055_v57 = vpop.eup %2054 }
 0x2e9   :  { %2058 = vrcp.f32 %v587_v9  ;;  %v593_v62 = vadd.f32 1.0, %v2055_v57  ;;  %v2057_v0 = vpop.eup %2056 }
 0x2ea   :  { %2060 = vtanh.f32 %v582_v63  ;;  %v600_v55 = vadd.f32 1.0, %v2057_v0  ;;  %v2989_v0 = vld [vmem:[%s3776_s1 + $0x1e0] sm:$0xff] }
 0x2eb   :  { %2062 = vrcp.f32 %v593_v62 }
 0x2ec   :  { %2064 = vrcp.f32 %v600_v55 }
 0x2f6   :  { %v2059_v56 = vpop.eup %2058 }
 0x2f7   :  { %v2061_v3 = vpop.eup %2060 }
 0x2f8   :  { %v2063_v59 = vpop.eup %2062  ;;  %v604_v54 = vmul.f32 %v2061_v3, %v2059_v56  ;;  %v3001_v56 = vld [vmem:[%s3776_s1 + $0x1c8] sm:$0xff]  ;;  %v3007_v3 = vld [vmem:[%s3776_s1 + $0x1d8] sm:$0xff] }
 0x2f9   :  { %v603_v52 = vmul.f32 %v2063_v59, %v2814_v46  ;;  %v2065_v60 = vpop.eup %2064  ;;  %v3013_v59 = vld [vmem:[%s3776_s1 + $0x1c0] sm:$0xff] }
 0x2fb   :  { %v2896_v53 = vadd.f32 %v604_v54, %v603_v52  ;;  %v3019_v54 = vld [vmem:[%s3776_s1 + $0x1d0] sm:$0xff]  ;;  %v3025_v52 = vld [vmem:[%s3776_s1 + $0x1a8] sm:$0xff] }
 0x2fd   :  { %2066 = vtanh.f32 %v2896_v53 }
 0x30a   :  { %v2067_v48 = vpop.eup %2066 }
 0x30b   :  { %v607_v50 = vmul.f32 %v2067_v48, %v2065_v60  ;;  %v3031_v60 = vld [vmem:[%s3776_s1 + $0x1b8] sm:$0xff]  ;;  %v3037_v48 = vld [vmem:[%s3776_s1 + $0x1a0] sm:$0xff] }
 0x30d   :  { %678 = vmatmul.mubr.f32.vlgmr.msra.gmra.mxu0 %v607_v50  ;;  %749 = vmatmul.mubr.f32.vlgmr.msra.gmra.mxu1 %v607_v50  ;;  %v3043_v50 = vld [vmem:[%s3776_s1 + $0x1b0] sm:$0xff] }
 0x30e   :  { %789 = vmatpush1.msra.mxu0 %v2272_v1  ;;  %860 = vmatpush1.msra.mxu1 %v2326_v11  ;;  %v3924_v1 = vld [vmem:[#allocation4_spill] sm:$0xff] }
 0x30f   :  { %790 = vmatprep.subr.mxu0 %v2277_v2  ;;  %861 = vmatprep.subr.mxu1 %v2338_v13  ;;  %v3925_v2 = vld [vmem:[#allocation11_spill] sm:$0xff]  ;;  %v3932_v11 = vld [vmem:[#allocation8_spill] sm:$0xff]  ;;  %v3934_v13 = vld [vmem:[#allocation10_spill] sm:$0xff] }
 0x310   :  { %791 = vmatpush1.msra.mxu0 %v2285_v4  ;;  %862 = vmatpush1.msra.mxu1 %v2343_v14  ;;  %v3926_v4 = vld [vmem:[#allocation5_spill] sm:$0xff]  ;;  %v3935_v14 = vld [vmem:[#allocation18_spill] sm:$0xff] }
 0x311   :  { %792 = vmatprep.subr.mxu0 %v2291_v5  ;;  %863 = vmatprep.subr.mxu1 %v2355_v16  ;;  %v3927_v5 = vld [vmem:[#allocation13_spill] sm:$0xff]  ;;  %v3937_v16 = vld [vmem:[#allocation19_spill] sm:$0xff] }
 0x312   :  { %793 = vmatpush1.msra.mxu0 %v2297_v6  ;;  %864 = vmatpush1.msra.mxu1 %v2367_v18  ;;  %v3928_v6 = vld [vmem:[#allocation6_spill] sm:$0xff]  ;;  %v3939_v18 = vmov 0.0  }
 0x313   :  { %794 = vmatprep.subr.mxu0 %v2303_v7  ;;  %865 = vmatprep.subr.mxu1 %v2372_v19  ;;  %v3929_v7 = vld [vmem:[#allocation15_spill] sm:$0xff]  ;;  %v3940_v19 = vld [vmem:[#allocation20_spill] sm:$0xff] }
 0x314   :  { %795 = vmatpush1.msra.mxu0 %v2309_v8  ;;  %866 = vmatpush1.msra.mxu1 %v2384_v21  ;;  %v3930_v8 = vld [vmem:[#allocation7_spill] sm:$0xff] }
 0x315   :  { %796 = vmatprep.subr.mxu0 %v2320_v10  ;;  %867 = vmatprep.subr.mxu1 %v2396_v23  ;;  %v3931_v10 = vld [vmem:[#allocation16_spill] sm:$0xff]  ;;  %v3942_v21 = vld [vmem:[#allocation3_spill] sm:$0xff] }
 0x316   :  { %797 = vmatpush1.msra.mxu0 %v2332_v12  ;;  %868 = vmatpush1.msra.mxu1 %v2408_v25  ;;  %v3933_v12 = vld [vmem:[#allocation17_spill] sm:$0xff] }
 0x317   :  { %798 = vmatprep.subr.mxu0 %v2349_v15  ;;  %869 = vmatprep.subr.mxu1 %v2420_v27  ;;  %v3936_v15 = vld [vmem:[#allocation12_spill] sm:$0xff] }
 0x318   :  { %799 = vmatpush1.msra.mxu0 %v2361_v17  ;;  %870 = vmatpush1.msra.mxu1 %v2432_v29  ;;  %v3938_v17 = vld [vmem:[#allocation14_spill] sm:$0xff] }
 0x319   :  { %800 = vmatprep.subr.mxu0 %v2378_v20  ;;  %871 = vmatprep.subr.mxu1 %v2444_v31  ;;  %v2966_v20 = vld [vmem:[%s3776_s1 + $0x1e8] sm:$0xff]  ;;  %v1873_v31 = vld [vmem:[%s3777_s0 + $0x78] sm:$0xff] }
 0x31a   :  { %801 = vmatpush1.msra.mxu0 %v2390_v22  ;;  %872 = vmatpush1.msra.mxu1 %v2456_v33  ;;  %3941 = vst [vmem:[#allocation9_spill] sm:$0xff] %v2966_v20  ;;  %v1870_v22 = vld [vmem:[%s3777_s0 + $0x60] sm:$0xff] }
 0x31b   :  { %802 = vmatprep.subr.mxu0 %v2402_v24  ;;  %873 = vmatprep.subr.mxu1 %v2468_v35  ;;  %v1871_v24 = vld [vmem:[%s3777_s0 + $0x68] sm:$0xff] }
 0x31c   :  { %803 = vmatpush1.msra.mxu0 %v2414_v26  ;;  %874 = vmatpush1.msra.mxu1 %v2480_v37 }
 0x31d   :  { %804 = vmatprep.subr.mxu0 %v2426_v28  ;;  %875 = vmatprep.subr.mxu1 %v2492_v39 }
 0x31e   :  { %805 = vmatpush1.msra.mxu0 %v2438_v30  ;;  %876 = vmatpush1.msra.mxu1 %v2504_v41 }
 0x31f   :  { %806 = vmatprep.subr.mxu0 %v2450_v32  ;;  %877 = vmatprep.subr.mxu1 %v2516_v43 }
 0x320   :  { %807 = vmatpush1.msra.mxu0 %v2462_v34  ;;  %878 = vmatpush1.msra.mxu1 %v2528_v45  ;;  %v1872_v34 = vld [vmem:[%s3777_s0 + $0x70] sm:$0xff] }
 0x321   :  { %808 = vmatprep.subr.mxu0 %v2474_v36  ;;  %879 = vmatprep.subr.mxu1 %v2540_v47 }
 0x322   :  { %809 = vmatpush1.msra.mxu0 %v2486_v38  ;;  %880 = vmatpush1.msra.mxu1 %v2552_v49 }
 0x323   :  { %810 = vmatprep.subr.mxu0 %v2498_v40  ;;  %881 = vmatprep.subr.mxu1 %v2564_v51 }
 0x324   :  { %811 = vmatpush1.msra.mxu0 %v2510_v42  ;;  %882 = vmatpush1.msra.mxu1 %v3885_v44 }
 0x325   :  { %812 = vmatprep.subr.mxu0 %v3924_v1  ;;  %883 = vmatprep.subr.mxu1 %v3925_v2  ;;  %v3049_v1 = vld [vmem:[%s3776_s1 + $0x188] sm:$0xff] }
 0x326   :  { %813 = vmatpush1.msra.mxu0 %v3926_v4  ;;  %884 = vmatpush1.msra.mxu1 %v3927_v5  ;;  %v3055_v4 = vld [vmem:[%s3776_s1 + $0x198] sm:$0xff] }
 0x327   :  { %814 = vmatprep.subr.mxu0 %v3928_v6  ;;  %885 = vmatprep.subr.mxu1 %v3929_v7  ;;  %v3061_v6 = vld [vmem:[%s3776_s1 + $0x180] sm:$0xff] }
 0x328   :  { %815 = vmatpush1.msra.mxu0 %v3930_v8  ;;  %886 = vmatpush1.msra.mxu1 %v3931_v10  ;;  %v3067_v8 = vld [vmem:[%s3776_s1 + $0x190] sm:$0xff] }
 0x329   :  { %816 = vmatprep.subr.mxu0 %v3932_v11  ;;  %887 = vmatprep.subr.mxu1 %v3933_v12  ;;  %v3073_v11 = vld [vmem:[%s3776_s1 + $0x168] sm:$0xff] }
 0x32a   :  { %817 = vmatpush1.msra.mxu0 %v3934_v13  ;;  %888 = vmatpush1.msra.mxu1 %v3935_v14  ;;  %v3079_v13 = vld [vmem:[%s3776_s1 + $0x178] sm:$0xff] }
 0x32b   :  { %818 = vmatprep.subr.mxu0 %v3936_v15  ;;  %889 = vmatprep.subr.mxu1 %v3937_v16 }
 0x32c   :  { %819 = vmatpush1.msra.mxu0 %v3938_v17  ;;  %852 = vmatprep.mubr.f32.mxu0 %v3939_v18 }
 0x32d   :  { %890 = vmatpush1.msra.mxu1 %v3940_v19  ;;  %923 = vmatprep.mubr.f32.mxu1 %v3939_v18 }
 0x32e   :  { %963 = vmatprep.subr.mxu0 %v2966_v20  ;;  %1034 = vmatprep.subr.mxu1 %v3942_v21  ;;  %v3085_v21 = vld [vmem:[%s3776_s1 + $0x160] sm:$0xff] }
 0x3cd   :  { %v679_v23 = vpop.f32.mrf.mxu0  ;;  %v750_v29 = vpop.f32.mrf.mxu1 }
 0x3ce   :  { %v755_v25 = vadd.f32 %v1870_v22, %v679_v23  ;;  %v757_v37 = vadd.f32 %v1872_v34, %v750_v29  ;;  %v3091_v22 = vld [vmem:[%s3776_s1 + $0x170] sm:$0xff]  ;;  %v3097_v23 = vld [vmem:[%s3776_s1 + $0x148] sm:$0xff]  ;;  %v3133_v29 = vld [vmem:[%s3776_s1 + $0x120] sm:$0xff] }
 0x3cf   :  { %v681_v26 = vpop.f32.mrf.mxu0  ;;  %v752_v32 = vpop.f32.mrf.mxu1  ;;  %v3163_v34 = vld [vmem:[%s3776_s1 + $0x110] sm:$0xff] }
 0x3d0   :  { %v1874_v27 = vmul.f32 -1.442695, %v755_v25  ;;  %v756_v28 = vadd.f32 %v1871_v24, %v681_v26  ;;  %v758_v33 = vadd.f32 %v1873_v31, %v752_v32  ;;  %v3103_v24 = vld [vmem:[%s3776_s1 + $0x158] sm:$0xff]  ;;  %v3109_v25 = vld [vmem:[%s3776_s1 + $0x140] sm:$0xff]  ;;  %v3115_v26 = vld [vmem:[%s3776_s1 + $0x150] sm:$0xff] }
 0x3d1   :  { %v3145_v31 = vld [vmem:[%s3776_s1 + $0x108] sm:$0xff]  ;;  %v3151_v32 = vld [vmem:[%s3776_s1 + $0x118] sm:$0xff] }
 0x3d2   :  { %2068 = vpow2.f32 %v1874_v27  ;;  %v1875_v30 = vmul.f32 -1.442695, %v756_v28  ;;  %v1876_v35 = vmul.f32 -1.442695, %v758_v33  ;;  %v3121_v27 = vld [vmem:[%s3776_s1 + $0x128] sm:$0xff]  ;;  %v3127_v28 = vld [vmem:[%s3776_s1 + $0x138] sm:$0xff] }
 0x3d3   :  { %v3157_v33 = vld [vmem:[%s3776_s1 + $0x100] sm:$0xff] }
 0x3d4   :  { %2070 = vpow2.f32 %v1875_v30  ;;  %v3139_v30 = vld [vmem:[%s3776_s1 + $0x130] sm:$0xff] }
 0x3d5   :  { %2072 = vpow2.f32 %v1876_v35  ;;  %v3169_v35 = vld [vmem:[%s3776_s1 + $0xe8] sm:$0xff] }
 0x3df   :  { %v2069_v36 = vpop.eup %2068 }
 0x3e0   :  { %v762_v38 = vadd.f32 1.0, %v2069_v36  ;;  %v3175_v36 = vld [vmem:[%s3776_s1 + $0xf8] sm:$0xff] }
 0x3e1   :  { %v2071_v39 = vpop.eup %2070 }
 0x3e2   :  { %2074 = vrcp.f32 %v762_v38  ;;  %v768_v40 = vadd.f32 1.0, %v2071_v39  ;;  %v2073_v41 = vpop.eup %2072  ;;  %v3187_v38 = vld [vmem:[%s3776_s1 + $0xf0] sm:$0xff]  ;;  %v3193_v39 = vld [vmem:[%s3776_s1 + $0xc8] sm:$0xff] }
 0x3e3   :  { %2076 = vtanh.f32 %v757_v37  ;;  %v775_v55 = vadd.f32 1.0, %v2073_v41  ;;  %v3181_v37 = vld [vmem:[%s3776_s1 + $0xe0] sm:$0xff] }
 0x3e4   :  { %2078 = vrcp.f32 %v768_v40  ;;  %v3199_v40 = vld [vmem:[%s3776_s1 + $0xd8] sm:$0xff]  ;;  %v3205_v41 = vld [vmem:[%s3776_s1 + $0xc0] sm:$0xff] }
 0x3e5   :  { %2080 = vrcp.f32 %v775_v55 }
 0x3ef   :  { %v2075_v42 = vpop.eup %2074 }
 0x3f0   :  { %v2077_v43 = vpop.eup %2076 }
 0x3f1   :  { %v2079_v46 = vpop.eup %2078  ;;  %v779_v61 = vmul.f32 %v2077_v43, %v2075_v42  ;;  %v3212_v42 = vld [vmem:[%s3776_s1 + $0xa8] sm:$0xff]  ;;  %v3219_v43 = vld [vmem:[%s3776_s1 + $0xa0] sm:$0xff] }
 0x3f2   :  { %v778_v58 = vmul.f32 %v2079_v46, %v2896_v53  ;;  %v2081_v9 = vpop.eup %2080  ;;  %v2995_v53 = vld [vmem:[%s3776_s1 + $0x1f0] sm:$0xff] }
 0x3f4   :  { %v2983_v63 = vadd.f32 %v779_v61, %v778_v58  ;;  %v1880_v58 = vld [vmem:[%s3777_s0 + $0x98] sm:$0xff] }
 0x3f6   :  { %2082 = vtanh.f32 %v2983_v63 }
 0x403   :  { %v2083_v57 = vpop.eup %2082 }
 0x404   :  { %v782_v62 = vmul.f32 %v2083_v57, %v2081_v9 }
 0x406   :  { %853 = vmatmul.mubr.f32.vlgmr.msra.gmra.mxu0 %v782_v62  ;;  %924 = vmatmul.mubr.f32.vlgmr.msra.gmra.mxu1 %v782_v62  ;;  %v1879_v62 = vld [vmem:[%s3777_s0 + $0x90] sm:$0xff] }
 0x407   :  { %964 = vmatpush1.msra.mxu0 %v2989_v0  ;;  %1035 = vmatpush1.msra.mxu1 %v2995_v53 }
 0x408   :  { %965 = vmatprep.subr.mxu0 %v3001_v56  ;;  %1036 = vmatprep.subr.mxu1 %v3007_v3 }
 0x409   :  { %966 = vmatpush1.msra.mxu0 %v3013_v59  ;;  %1037 = vmatpush1.msra.mxu1 %v3019_v54 }
 0x40a   :  { %967 = vmatprep.subr.mxu0 %v3025_v52  ;;  %1038 = vmatprep.subr.mxu1 %v3031_v60 }
 0x40b   :  { %968 = vmatpush1.msra.mxu0 %v3037_v48  ;;  %1039 = vmatpush1.msra.mxu1 %v3043_v50 }
 0x40c   :  { %969 = vmatprep.subr.mxu0 %v3049_v1  ;;  %1040 = vmatprep.subr.mxu1 %v3055_v4 }
 0x40d   :  { %970 = vmatpush1.msra.mxu0 %v3061_v6  ;;  %1041 = vmatpush1.msra.mxu1 %v3067_v8 }
 0x40e   :  { %971 = vmatprep.subr.mxu0 %v3073_v11  ;;  %1042 = vmatprep.subr.mxu1 %v3079_v13 }
 0x40f   :  { %972 = vmatpush1.msra.mxu0 %v3085_v21  ;;  %1043 = vmatpush1.msra.mxu1 %v3091_v22 }
 0x410   :  { %973 = vmatprep.subr.mxu0 %v3097_v23  ;;  %1044 = vmatprep.subr.mxu1 %v3103_v24 }
 0x411   :  { %974 = vmatpush1.msra.mxu0 %v3109_v25  ;;  %1045 = vmatpush1.msra.mxu1 %v3115_v26 }
 0x412   :  { %975 = vmatprep.subr.mxu0 %v3121_v27  ;;  %1046 = vmatprep.subr.mxu1 %v3127_v28 }
 0x413   :  { %976 = vmatpush1.msra.mxu0 %v3133_v29  ;;  %1047 = vmatpush1.msra.mxu1 %v3139_v30 }
 0x414   :  { %977 = vmatprep.subr.mxu0 %v3145_v31  ;;  %1048 = vmatprep.subr.mxu1 %v3151_v32 }
 0x415   :  { %978 = vmatpush1.msra.mxu0 %v3157_v33  ;;  %1049 = vmatpush1.msra.mxu1 %v3163_v34 }
 0x416   :  { %979 = vmatprep.subr.mxu0 %v3169_v35  ;;  %1050 = vmatprep.subr.mxu1 %v3175_v36 }
 0x417   :  { %980 = vmatpush1.msra.mxu0 %v3181_v37  ;;  %1051 = vmatpush1.msra.mxu1 %v3187_v38 }
 0x418   :  { %981 = vmatprep.subr.mxu0 %v3193_v39  ;;  %1052 = vmatprep.subr.mxu1 %v3199_v40 }
 0x419   :  { %982 = vmatpush1.msra.mxu0 %v3205_v41  ;;  %1053 = vmatpush1.msra.mxu1 %v2528_v45  ;;  %v3226_v45 = vld [vmem:[%s3776_s1 + $0x88] sm:$0xff] }
 0x41a   :  { %983 = vmatprep.subr.mxu0 %v3212_v42  ;;  %1054 = vmatprep.subr.mxu1 %v2540_v47  ;;  %v3233_v47 = vld [vmem:[%s3776_s1 + $0x80] sm:$0xff] }
 0x41b   :  { %984 = vmatpush1.msra.mxu0 %v3219_v43  ;;  %1055 = vmatpush1.msra.mxu1 %v2552_v49  ;;  %v3240_v49 = vld [vmem:[%s3776_s1 + $0x68] sm:$0xff] }
 0x41c   :  { %985 = vmatprep.subr.mxu0 %v3226_v45  ;;  %1056 = vmatprep.subr.mxu1 %v2564_v51  ;;  %3943 = vst [vmem:[#allocation2_spill] sm:$0xff] %v3240_v49  ;;  %v3247_v51 = vld [vmem:[%s3776_s1 + $0x60] sm:$0xff] }
 0x41d   :  { %986 = vmatpush1.msra.mxu0 %v3233_v47  ;;  %1057 = vmatpush1.msra.mxu1 %v3885_v44  ;;  %3944 = vst [vmem:[#allocation4_spill] sm:$0xff] %v3247_v51  ;;  %v3254_v44 = vld [vmem:[%s3776_s1 + $0x48] sm:$0xff] }
 0x41e   :  { %987 = vmatprep.subr.mxu0 %v3240_v49  ;;  %1058 = vmatprep.subr.mxu1 %v3925_v2  ;;  %3945 = vst [vmem:[#allocation11_spill] sm:$0xff] %v3254_v44  ;;  %v3261_v2 = vld [vmem:[%s3776_s1 + $0x40] sm:$0xff] }
 0x41f   :  { %988 = vmatpush1.msra.mxu0 %v3247_v51  ;;  %1059 = vmatpush1.msra.mxu1 %v3927_v5  ;;  %3946 = vst [vmem:[#allocation5_spill] sm:$0xff] %v3261_v2  ;;  %v3268_v5 = vld [vmem:[%s3776_s1 + $0x28] sm:$0xff] }
 0x420   :  { %989 = vmatprep.subr.mxu0 %v3254_v44  ;;  %1060 = vmatprep.subr.mxu1 %v3929_v7  ;;  %3947 = vst [vmem:[#allocation13_spill] sm:$0xff] %v3268_v5  ;;  %v3275_v7 = vld [vmem:[%s3776_s1 + $0x20] sm:$0xff] }
 0x421   :  { %990 = vmatpush1.msra.mxu0 %v3261_v2  ;;  %1061 = vmatpush1.msra.mxu1 %v3931_v10  ;;  %3948 = vst [vmem:[#allocation6_spill] sm:$0xff] %v3275_v7  ;;  %v3289_v10 = vld [vmem:[%s3776_s1 + $0x1f8] sm:$0xff] }
 0x422   :  { %991 = vmatprep.subr.mxu0 %v3268_v5  ;;  %1062 = vmatprep.subr.mxu1 %v3933_v12  ;;  %3949 = vst [vmem:[#allocation15_spill] sm:$0xff] %v3289_v10  ;;  %v1877_v12 = vld [vmem:[%s3777_s0 + $0x80] sm:$0xff] }
 0x423   :  { %992 = vmatpush1.msra.mxu0 %v3275_v7  ;;  %1063 = vmatpush1.msra.mxu1 %v3935_v14 }
 0x424   :  { %993 = vmatprep.subr.mxu0 %v3936_v15  ;;  %1064 = vmatprep.subr.mxu1 %v3937_v16  ;;  %v1878_v15 = vld [vmem:[%s3777_s0 + $0x88] sm:$0xff] }
 0x425   :  { %994 = vmatpush1.msra.mxu0 %v3938_v17  ;;  %1027 = vmatprep.mubr.f32.mxu0 %v3939_v18 }
 0x426   :  { %1065 = vmatpush1.msra.mxu1 %v3940_v19  ;;  %1098 = vmatprep.mubr.f32.mxu1 %v3939_v18 }
 0x427   :  { %1138 = vmatprep.subr.mxu0 %v2966_v20  ;;  %1209 = vmatprep.subr.mxu1 %v3289_v10 }
 0x4c6   :  { %v854_v14 = vpop.f32.mrf.mxu0  ;;  %v925_v55 = vpop.f32.mrf.mxu1 }
 0x4c7   :  { %v930_v16 = vadd.f32 %v1877_v12, %v854_v14  ;;  %v932_v12 = vadd.f32 %v1879_v62, %v925_v55  ;;  %v3369_v62 = vld [vmem:[%s3776_s1 + $0x98] sm:$0xff] }
 0x4c8   :  { %v856_v17 = vpop.f32.mrf.mxu0  ;;  %v927_v9 = vpop.f32.mrf.mxu1 }
 0x4c9   :  { %v1881_v19 = vmul.f32 -1.442695, %v930_v16  ;;  %v931_v46 = vadd.f32 %v1878_v15, %v856_v17  ;;  %v933_v57 = vadd.f32 %v1880_v58, %v927_v9 }
 0x4cb   :  { %2084 = vpow2.f32 %v1881_v19  ;;  %v1882_v61 = vmul.f32 -1.442695, %v931_v46  ;;  %v1883_v10 = vmul.f32 -1.442695, %v933_v57  ;;  %v3362_v57 = vld [vmem:[%s3776_s1 + $0xb0] sm:$0xff] }
 0x4cd   :  { %2086 = vpow2.f32 %v1882_v61 }
 0x4ce   :  { %2088 = vpow2.f32 %v1883_v10 }
 0x4d8   :  { %v2085_v20 = vpop.eup %2084 }
 0x4d9   :  { %v937_v14 = vadd.f32 1.0, %v2085_v20 }
 0x4da   :  { %v2087_v16 = vpop.eup %2086 }
 0x4db   :  { %2090 = vrcp.f32 %v937_v14  ;;  %v943_v15 = vadd.f32 1.0, %v2087_v16  ;;  %v2089_v17 = vpop.eup %2088  ;;  %v3383_v14 = vld [vmem:[%s3776_s1 + $0x78] sm:$0xff]  ;;  %v3390_v16 = vld [vmem:[%s3776_s1 + $0x70] sm:$0xff] }
 0x4dc   :  { %2092 = vtanh.f32 %v932_v12  ;;  %v950_v18 = vadd.f32 1.0, %v2089_v17  ;;  %v3376_v12 = vld [vmem:[%s3776_s1 + $0x90] sm:$0xff]  ;;  %3950 = vst [vmem:[#allocation7_spill] sm:$0xff] %v3383_v14  ;;  %3951 = vst [vmem:[#allocation16_spill] sm:$0xff] %v3390_v16 }
 0x4dd   :  { %2094 = vrcp.f32 %v943_v15  ;;  %v3397_v15 = vld [vmem:[%s3776_s1 + $0x58] sm:$0xff]  ;;  %v3404_v17 = vld [vmem:[%s3776_s1 + $0x50] sm:$0xff] }
 0x4de   :  { %2096 = vrcp.f32 %v950_v18  ;;  %v3348_v18 = vld [vmem:[%s3776_s1 + $0xd0] sm:$0xff]  ;;  %3952 = vst [vmem:[#allocation8_spill] sm:$0xff] %v3397_v15  ;;  %3953 = vst [vmem:[#allocation17_spill] sm:$0xff] %v3404_v17 }
 0x4e8   :  { %v2091_v19 = vpop.eup %2090 }
 0x4e9   :  { %v2093_v46 = vpop.eup %2092 }
 0x4ea   :  { %v2095_v61 = vpop.eup %2094  ;;  %v954_v58 = vmul.f32 %v2093_v46, %v2091_v19  ;;  %v3411_v19 = vld [vmem:[%s3776_s1 + $0x38] sm:$0xff]  ;;  %v3955_v46 = vld [vmem:[#allocation6_spill] sm:$0xff] }
 0x4eb   :  { %v953_v9 = vmul.f32 %v2095_v61, %v2983_v63  ;;  %v2097_v20 = vpop.eup %2096  ;;  %v3355_v63 = vld [vmem:[%s3776_s1 + $0xb8] sm:$0xff]  ;;  %3954 = vst [vmem:[#allocation10_spill] sm:$0xff] %v3411_v19  ;;  %v3418_v61 = vld [vmem:[%s3776_s1 + $0x30] sm:$0xff] }
 0x4ec   :  { %3956 = vst [vmem:[#allocation18_spill] sm:$0xff] %v3418_v61 }
 0x4ed   :  { %v3305_v7 = vadd.f32 %v954_v58, %v953_v9  ;;  %v3424_v58 = vld [vmem:[%s3776_s1 + $0x8] sm:$0xff]  ;;  %v3430_v9 = vld [vmem:[%s3776_s1 + $0x18] sm:$0xff] }
 0x4ee   :  { %3957 = vst [vmem:[#allocation12_spill] sm:$0xff] %v3424_v58  ;;  %3958 = vst [vmem:[#allocation19_spill] sm:$0xff] %v3430_v9 }
 0x4ef   :  { %2098 = vtanh.f32 %v3305_v7 }
 0x4fc   :  { %v2099_v55 = vpop.eup %2098 }
 0x4fd   :  { %v957_v10 = vmul.f32 %v2099_v55, %v2097_v20  ;;  %v3436_v20 = vld [vmem:[%s3776_s1] sm:$0xff]  ;;  %v3960_v55 = vmov 0.0  }
 0x4fe   :  { %3959 = vst [vmem:[#allocation14_spill] sm:$0xff] %v3436_v20 }
 0x4ff   :  { %1028 = vmatmul.mubr.f32.vlgmr.msra.gmra.mxu0 %v957_v10  ;;  %1099 = vmatmul.mubr.f32.vlgmr.msra.gmra.mxu1 %v957_v10  ;;  %v3443_v10 = vld [vmem:[%s3776_s1 + $0x10] sm:$0xff] }
 0x500   :  { %1139 = vmatpush1.msra.mxu0 %v2989_v0  ;;  %1210 = vmatpush1.msra.mxu1 %v2995_v53  ;;  %3961 = vst [vmem:[#allocation20_spill] sm:$0xff] %v3443_v10 }
 0x501   :  { %1140 = vmatprep.subr.mxu0 %v3001_v56  ;;  %1211 = vmatprep.subr.mxu1 %v3007_v3 }
 0x502   :  { %1141 = vmatpush1.msra.mxu0 %v3013_v59  ;;  %1212 = vmatpush1.msra.mxu1 %v3019_v54 }
 0x503   :  { %1142 = vmatprep.subr.mxu0 %v3025_v52  ;;  %1213 = vmatprep.subr.mxu1 %v3031_v60 }
 0x504   :  { %1143 = vmatpush1.msra.mxu0 %v3037_v48  ;;  %1214 = vmatpush1.msra.mxu1 %v3043_v50 }
 0x505   :  { %1144 = vmatprep.subr.mxu0 %v3049_v1  ;;  %1215 = vmatprep.subr.mxu1 %v3055_v4 }
 0x506   :  { %1145 = vmatpush1.msra.mxu0 %v3061_v6  ;;  %1216 = vmatpush1.msra.mxu1 %v3067_v8 }
 0x507   :  { %1146 = vmatprep.subr.mxu0 %v3073_v11  ;;  %1217 = vmatprep.subr.mxu1 %v3079_v13 }
 0x508   :  { %1147 = vmatpush1.msra.mxu0 %v3085_v21  ;;  %1218 = vmatpush1.msra.mxu1 %v3091_v22 }
 0x509   :  { %1148 = vmatprep.subr.mxu0 %v3097_v23  ;;  %1219 = vmatprep.subr.mxu1 %v3103_v24 }
 0x50a   :  { %1149 = vmatpush1.msra.mxu0 %v3109_v25  ;;  %1220 = vmatpush1.msra.mxu1 %v3115_v26 }
 0x50b   :  { %1150 = vmatprep.subr.mxu0 %v3121_v27  ;;  %1221 = vmatprep.subr.mxu1 %v3127_v28 }
 0x50c   :  { %1151 = vmatpush1.msra.mxu0 %v3133_v29  ;;  %1222 = vmatpush1.msra.mxu1 %v3139_v30 }
 0x50d   :  { %1152 = vmatprep.subr.mxu0 %v3145_v31  ;;  %1223 = vmatprep.subr.mxu1 %v3151_v32 }
 0x50e   :  { %1153 = vmatpush1.msra.mxu0 %v3157_v33  ;;  %1224 = vmatpush1.msra.mxu1 %v3163_v34 }
 0x50f   :  { %1154 = vmatprep.subr.mxu0 %v3169_v35  ;;  %1225 = vmatprep.subr.mxu1 %v3175_v36 }
 0x510   :  { %1155 = vmatpush1.msra.mxu0 %v3181_v37  ;;  %1226 = vmatpush1.msra.mxu1 %v3187_v38 }
 0x511   :  { %1156 = vmatprep.subr.mxu0 %v3193_v39  ;;  %1227 = vmatprep.subr.mxu1 %v3199_v40 }
 0x512   :  { %1157 = vmatpush1.msra.mxu0 %v3205_v41  ;;  %1228 = vmatpush1.msra.mxu1 %v3348_v18 }
 0x513   :  { %1158 = vmatprep.subr.mxu0 %v3212_v42  ;;  %1229 = vmatprep.subr.mxu1 %v3355_v63 }
 0x514   :  { %1159 = vmatpush1.msra.mxu0 %v3219_v43  ;;  %1230 = vmatpush1.msra.mxu1 %v3362_v57 }
 0x515   :  { %1160 = vmatprep.subr.mxu0 %v3226_v45  ;;  %1231 = vmatprep.subr.mxu1 %v3369_v62 }
 0x516   :  { %1161 = vmatpush1.msra.mxu0 %v3233_v47  ;;  %1232 = vmatpush1.msra.mxu1 %v3376_v12 }
 0x517   :  { %1162 = vmatprep.subr.mxu0 %v3240_v49  ;;  %1233 = vmatprep.subr.mxu1 %v3383_v14 }
 0x518   :  { %1163 = vmatpush1.msra.mxu0 %v3247_v51  ;;  %1234 = vmatpush1.msra.mxu1 %v3390_v16 }
 0x519   :  { %1164 = vmatprep.subr.mxu0 %v3254_v44  ;;  %1235 = vmatprep.subr.mxu1 %v3397_v15  ;;  %v1886_v44 = vld [vmem:[%s3777_s0 + $0xb0] sm:$0xff] }
 0x51a   :  { %1165 = vmatpush1.msra.mxu0 %v3261_v2  ;;  %1236 = vmatpush1.msra.mxu1 %v3404_v17 }
 0x51b   :  { %1166 = vmatprep.subr.mxu0 %v3268_v5  ;;  %1237 = vmatprep.subr.mxu1 %v3411_v19 }
 0x51c   :  { %1167 = vmatpush1.msra.mxu0 %v3955_v46  ;;  %1238 = vmatpush1.msra.mxu1 %v3418_v61  ;;  %v1884_v61 = vld [vmem:[%s3777_s0 + $0xa0] sm:$0xff]  ;;  %v1885_v46 = vld [vmem:[%s3777_s0 + $0xa8] sm:$0xff] }
 0x51d   :  { %1168 = vmatprep.subr.mxu0 %v3424_v58  ;;  %1239 = vmatprep.subr.mxu1 %v3430_v9  ;;  %v3962_v58 = vld [vmem:[#allocation9_spill] sm:$0xff]  ;;  %v3963_v9 = vld [vmem:[#allocation15_spill] sm:$0xff] }
 0x51e   :  { %1169 = vmatpush1.msra.mxu0 %v3436_v20  ;;  %1202 = vmatprep.mubr.f32.mxu0 %v3960_v55 }
 0x51f   :  { %1240 = vmatpush1.msra.mxu1 %v3443_v10  ;;  %1273 = vmatprep.mubr.f32.mxu1 %v3960_v55 }
 0x520   :  { %1313 = vmatprep.subr.mxu0 %v3962_v58  ;;  %1384 = vmatprep.subr.mxu1 %v3963_v9  ;;  %v1887_v9 = vld [vmem:[%s3777_s0 + $0xb8] sm:$0xff] }
 0x5bf   :  { %v1029_v20 = vpop.f32.mrf.mxu0  ;;  %v1100_v10 = vpop.f32.mrf.mxu1 }
 0x5c0   :  { %v1105_v19 = vadd.f32 %v1884_v61, %v1029_v20  ;;  %v1107_v61 = vadd.f32 %v1886_v44, %v1100_v10  ;;  %v3967_v10 = vld [vmem:[#allocation16_spill] sm:$0xff] }
 0x5c1   :  { %v1031_v5 = vpop.f32.mrf.mxu0  ;;  %v1102_v58 = vpop.f32.mrf.mxu1 }
 0x5c2   :  { %v1888_v17 = vmul.f32 -1.442695, %v1105_v19  ;;  %v1106_v2 = vadd.f32 %v1885_v46, %v1031_v5  ;;  %v1108_v15 = vadd.f32 %v1887_v9, %v1102_v58 }
 0x5c4   :  { %2100 = vpow2.f32 %v1888_v17  ;;  %v1889_v55 = vmul.f32 -1.442695, %v1106_v2  ;;  %v1890_v16 = vmul.f32 -1.442695, %v1108_v15  ;;  %v3966_v15 = vld [vmem:[#allocation4_spill] sm:$0xff] }
 0x5c6   :  { %2102 = vpow2.f32 %v1889_v55 }
 0x5c7   :  { %2104 = vpow2.f32 %v1890_v16 }
 0x5d1   :  { %v2101_v51 = vpop.eup %2100 }
 0x5d2   :  { %v1112_v20 = vadd.f32 1.0, %v2101_v51 }
 0x5d3   :  { %v2103_v19 = vpop.eup %2102 }
 0x5d4   :  { %2106 = vrcp.f32 %v1112_v20  ;;  %v1118_v5 = vadd.f32 1.0, %v2103_v19  ;;  %v2105_v2 = vpop.eup %2104  ;;  %v3969_v20 = vld [vmem:[#allocation8_spill] sm:$0xff]  ;;  %v3970_v19 = vld [vmem:[#allocation5_spill] sm:$0xff] }
 0x5d5   :  { %2108 = vtanh.f32 %v1107_v61  ;;  %v1125_v14 = vadd.f32 1.0, %v2105_v2  ;;  %v3968_v61 = vld [vmem:[#allocation11_spill] sm:$0xff]  ;;  %v3972_v2 = vld [vmem:[#allocation13_spill] sm:$0xff] }
 0x5d6   :  { %2110 = vrcp.f32 %v1118_v5  ;;  %v3971_v5 = vld [vmem:[#allocation17_spill] sm:$0xff] }
 0x5d7   :  { %2112 = vrcp.f32 %v1125_v14  ;;  %v3965_v14 = vld [vmem:[#allocation7_spill] sm:$0xff] }
 0x5e1   :  { %v2107_v17 = vpop.eup %2106 }
 0x5e2   :  { %v2109_v46 = vpop.eup %2108 }
 0x5e3   :  { %v2111_v55 = vpop.eup %2110  ;;  %v1129_v58 = vmul.f32 %v2109_v46, %v2107_v17  ;;  %v3973_v17 = vld [vmem:[#allocation10_spill] sm:$0xff] }
 0x5e4   :  { %v1128_v9 = vmul.f32 %v2111_v55, %v3305_v7  ;;  %v2113_v51 = vpop.eup %2112  ;;  %v3964_v7 = vld [vmem:[#allocation2_spill] sm:$0xff] }
 0x5e5   :  { %v3974_v46 = vld [vmem:[#allocation6_spill] sm:$0xff] }
 0x5e6   :  { %v3462_v49 = vadd.f32 %v1129_v58, %v1128_v9  ;;  %v3975_v55 = vld [vmem:[#allocation18_spill] sm:$0xff]  ;;  %v3976_v58 = vld [vmem:[#allocation12_spill] sm:$0xff]  ;;  %v3977_v9 = vld [vmem:[#allocation19_spill] sm:$0xff] }
 0x5e8   :  { %2114 = vtanh.f32 %v3462_v49 }
 0x5f5   :  { %v2115_v44 = vpop.eup %2114 }
 0x5f6   :  { %v1132_v16 = vmul.f32 %v2115_v44, %v2113_v51  ;;  %v3978_v51 = vld [vmem:[#allocation14_spill] sm:$0xff]  ;;  %v3979_v44 = vmov 0.0  }
 0x5f8   :  { %1203 = vmatmul.mubr.f32.vlgmr.msra.gmra.mxu0 %v1132_v16  ;;  %1274 = vmatmul.mubr.f32.vlgmr.msra.gmra.mxu1 %v1132_v16  ;;  %v3980_v16 = vld [vmem:[#allocation20_spill] sm:$0xff] }
 0x5f9   :  { %1314 = vmatpush1.msra.mxu0 %v2989_v0  ;;  %1385 = vmatpush1.msra.mxu1 %v2995_v53 }
 0x5fa   :  { %1315 = vmatprep.subr.mxu0 %v3001_v56  ;;  %1386 = vmatprep.subr.mxu1 %v3007_v3 }
 0x5fb   :  { %1316 = vmatpush1.msra.mxu0 %v3013_v59  ;;  %1387 = vmatpush1.msra.mxu1 %v3019_v54 }
 0x5fc   :  { %1317 = vmatprep.subr.mxu0 %v3025_v52  ;;  %1388 = vmatprep.subr.mxu1 %v3031_v60 }
 0x5fd   :  { %1318 = vmatpush1.msra.mxu0 %v3037_v48  ;;  %1389 = vmatpush1.msra.mxu1 %v3043_v50 }
 0x5fe   :  { %1319 = vmatprep.subr.mxu0 %v3049_v1  ;;  %1390 = vmatprep.subr.mxu1 %v3055_v4 }
 0x5ff   :  { %1320 = vmatpush1.msra.mxu0 %v3061_v6  ;;  %1391 = vmatpush1.msra.mxu1 %v3067_v8 }
 0x600   :  { %1321 = vmatprep.subr.mxu0 %v3073_v11  ;;  %1392 = vmatprep.subr.mxu1 %v3079_v13 }
 0x601   :  { %1322 = vmatpush1.msra.mxu0 %v3085_v21  ;;  %1393 = vmatpush1.msra.mxu1 %v3091_v22 }
 0x602   :  { %1323 = vmatprep.subr.mxu0 %v3097_v23  ;;  %1394 = vmatprep.subr.mxu1 %v3103_v24 }
 0x603   :  { %1324 = vmatpush1.msra.mxu0 %v3109_v25  ;;  %1395 = vmatpush1.msra.mxu1 %v3115_v26 }
 0x604   :  { %1325 = vmatprep.subr.mxu0 %v3121_v27  ;;  %1396 = vmatprep.subr.mxu1 %v3127_v28 }
 0x605   :  { %1326 = vmatpush1.msra.mxu0 %v3133_v29  ;;  %1397 = vmatpush1.msra.mxu1 %v3139_v30 }
 0x606   :  { %1327 = vmatprep.subr.mxu0 %v3145_v31  ;;  %1398 = vmatprep.subr.mxu1 %v3151_v32 }
 0x607   :  { %1328 = vmatpush1.msra.mxu0 %v3157_v33  ;;  %1399 = vmatpush1.msra.mxu1 %v3163_v34 }
 0x608   :  { %1329 = vmatprep.subr.mxu0 %v3169_v35  ;;  %1400 = vmatprep.subr.mxu1 %v3175_v36 }
 0x609   :  { %1330 = vmatpush1.msra.mxu0 %v3181_v37  ;;  %1401 = vmatpush1.msra.mxu1 %v3187_v38 }
 0x60a   :  { %1331 = vmatprep.subr.mxu0 %v3193_v39  ;;  %1402 = vmatprep.subr.mxu1 %v3199_v40 }
 0x60b   :  { %1332 = vmatpush1.msra.mxu0 %v3205_v41  ;;  %1403 = vmatpush1.msra.mxu1 %v3348_v18 }
 0x60c   :  { %1333 = vmatprep.subr.mxu0 %v3212_v42  ;;  %1404 = vmatprep.subr.mxu1 %v3355_v63 }
 0x60d   :  { %1334 = vmatpush1.msra.mxu0 %v3219_v43  ;;  %1405 = vmatpush1.msra.mxu1 %v3362_v57 }
 0x60e   :  { %1335 = vmatprep.subr.mxu0 %v3226_v45  ;;  %1406 = vmatprep.subr.mxu1 %v3369_v62 }
 0x60f   :  { %1336 = vmatpush1.msra.mxu0 %v3233_v47  ;;  %1407 = vmatpush1.msra.mxu1 %v3376_v12 }
 0x610   :  { %1337 = vmatprep.subr.mxu0 %v3964_v7  ;;  %1408 = vmatprep.subr.mxu1 %v3965_v14 }
 0x611   :  { %1338 = vmatpush1.msra.mxu0 %v3966_v15  ;;  %1409 = vmatpush1.msra.mxu1 %v3967_v10 }
 0x612   :  { %1339 = vmatprep.subr.mxu0 %v3968_v61  ;;  %1410 = vmatprep.subr.mxu1 %v3969_v20  ;;  %v1893_v61 = vld [vmem:[%s3777_s0 + $0xd0] sm:$0xff] }
 0x613   :  { %1340 = vmatpush1.msra.mxu0 %v3970_v19  ;;  %1411 = vmatpush1.msra.mxu1 %v3971_v5  ;;  %v3981_v5 = vld [vmem:[#allocation9_spill] sm:$0xff] }
 0x614   :  { %1341 = vmatprep.subr.mxu0 %v3972_v2  ;;  %1412 = vmatprep.subr.mxu1 %v3973_v17  ;;  %v3982_v2 = vld [vmem:[#allocation15_spill] sm:$0xff] }
 0x615   :  { %1342 = vmatpush1.msra.mxu0 %v3974_v46  ;;  %1413 = vmatpush1.msra.mxu1 %v3975_v55  ;;  %v1891_v55 = vld [vmem:[%s3777_s0 + $0xc0] sm:$0xff] }
 0x616   :  { %1343 = vmatprep.subr.mxu0 %v3976_v58  ;;  %1414 = vmatprep.subr.mxu1 %v3977_v9  ;;  %v1892_v9 = vld [vmem:[%s3777_s0 + $0xc8] sm:$0xff] }
 0x617   :  { %1344 = vmatpush1.msra.mxu0 %v3978_v51  ;;  %1377 = vmatprep.mubr.f32.mxu0 %v3979_v44 }
 0x618   :  { %1415 = vmatpush1.msra.mxu1 %v3980_v16  ;;  %1448 = vmatprep.mubr.f32.mxu1 %v3979_v44 }
 0x619   :  { %1488 = vmatprep.subr.mxu0 %v3981_v5  ;;  %1559 = vmatprep.subr.mxu1 %v3982_v2  ;;  %v1894_v5 = vld [vmem:[%s3777_s0 + $0xd8] sm:$0xff] }
 0x6b8   :  { %v1204_v46 = vpop.f32.mrf.mxu0  ;;  %v1275_v16 = vpop.f32.mrf.mxu1 }
 0x6b9   :  { %v1280_v51 = vadd.f32 %v1891_v55, %v1204_v46  ;;  %v1282_v46 = vadd.f32 %v1893_v61, %v1275_v16  ;;  %v1670_v16 = vld [vmem:[%s3778_s2 + $0x60] sm:$0xff] }
 0x6ba   :  { %v1206_v58 = vpop.f32.mrf.mxu0  ;;  %v1277_v2 = vpop.f32.mrf.mxu1 }
 0x6bb   :  { %v1895_v17 = vmul.f32 -1.442695, %v1280_v51  ;;  %v1281_v19 = vadd.f32 %v1892_v9, %v1206_v58  ;;  %v1283_v20 = vadd.f32 %v1894_v5, %v1277_v2 }
 0x6bd   :  { %2116 = vpow2.f32 %v1895_v17  ;;  %v1896_v44 = vmul.f32 -1.442695, %v1281_v19  ;;  %v1897_v10 = vmul.f32 -1.442695, %v1283_v20  ;;  %v1671_v20 = vld [vmem:[%s3778_s2 + $0x68] sm:$0xff] }
 0x6bf   :  { %2118 = vpow2.f32 %v1896_v44 }
 0x6c0   :  { %2120 = vpow2.f32 %v1897_v10 }
 0x6ca   :  { %v2117_v15 = vpop.eup %2116 }
 0x6cb   :  { %v1287_v55 = vadd.f32 1.0, %v2117_v15 }
 0x6cc   :  { %v2119_v51 = vpop.eup %2118 }
 0x6cd   :  { %2122 = vrcp.f32 %v1287_v55  ;;  %v1293_v17 = vadd.f32 1.0, %v2119_v51  ;;  %v2121_v19 = vpop.eup %2120  ;;  %v1668_v55 = vld [vmem:[%s3778_s2 + $0x50] sm:$0xff]  ;;  %v1667_v51 = vld [vmem:[%s3778_s2 + $0x48] sm:$0xff] }
 0x6ce   :  { %2124 = vtanh.f32 %v1282_v46  ;;  %v1300_v14 = vadd.f32 1.0, %v2121_v19  ;;  %v1669_v46 = vld [vmem:[%s3778_s2 + $0x58] sm:$0xff] }
 0x6cf   :  { %2126 = vrcp.f32 %v1293_v17  ;;  %v1666_v17 = vld [vmem:[%s3778_s2 + $0x40] sm:$0xff]  ;;  %v1665_v19 = vld [vmem:[%s3778_s2 + $0x38] sm:$0xff] }
 0x6d0   :  { %2128 = vrcp.f32 %v1300_v14  ;;  %v1673_v14 = vld [vmem:[%s3778_s2 + $0x78] sm:$0xff] }
 0x6da   :  { %v2123_v58 = vpop.eup %2122 }
 0x6db   :  { %v2125_v9 = vpop.eup %2124 }
 0x6dc   :  { %v2127_v44 = vpop.eup %2126  ;;  %v1304_v5 = vmul.f32 %v2125_v9, %v2123_v58  ;;  %v1664_v58 = vld [vmem:[%s3778_s2 + $0x30] sm:$0xff]  ;;  %v1663_v9 = vld [vmem:[%s3778_s2 + $0x28] sm:$0xff] }
 0x6dd   :  { %v1303_v2 = vmul.f32 %v2127_v44, %v3462_v49  ;;  %v2129_v15 = vpop.eup %2128  ;;  %v1662_v44 = vld [vmem:[%s3778_s2 + $0x20] sm:$0xff] }
 0x6df   :  { %v3544_v7 = vadd.f32 %v1304_v5, %v1303_v2  ;;  %v1661_v5 = vld [vmem:[%s3778_s2 + $0x18] sm:$0xff]  ;;  %v1660_v2 = vld [vmem:[%s3778_s2 + $0x10] sm:$0xff] }
 0x6e1   :  { %2130 = vtanh.f32 %v3544_v7 }
 0x6ee   :  { %v2131_v61 = vpop.eup %2130 }
 0x6ef   :  { %v1307_v10 = vmul.f32 %v2131_v61, %v2129_v15  ;;  %v1659_v15 = vld [vmem:[%s3778_s2 + $0x8] sm:$0xff]  ;;  %v1658_v61 = vld [vmem:[%s3778_s2] sm:$0xff] }
 0x6f1   :  { %1378 = vmatmul.mubr.f32.vlgmr.msra.gmra.mxu0 %v1307_v10  ;;  %1449 = vmatmul.mubr.f32.vlgmr.msra.gmra.mxu1 %v1307_v10  ;;  %v1760_v10 = vld [vmem:[%s3779_s3 + $0x78] sm:$0xff] }
 0x6f2   :  { %1489 = vmatpush1.msra.mxu0 %v2989_v0  ;;  %1560 = vmatpush1.msra.mxu1 %v2995_v53  ;;  %v3983_v0 = vld [vmem:[#allocation2_spill] sm:$0xff]  ;;  %v3984_v53 = vld [vmem:[#allocation7_spill] sm:$0xff] }
 0x6f3   :  { %1490 = vmatprep.subr.mxu0 %v3001_v56  ;;  %1561 = vmatprep.subr.mxu1 %v3007_v3  ;;  %v3985_v56 = vld [vmem:[#allocation4_spill] sm:$0xff] }
 0x6f4   :  { %1491 = vmatpush1.msra.mxu0 %v3013_v59  ;;  %1562 = vmatpush1.msra.mxu1 %v3019_v54  ;;  %v3986_v3 = vld [vmem:[#allocation16_spill] sm:$0xff]  ;;  %v3987_v59 = vld [vmem:[#allocation11_spill] sm:$0xff] }
 0x6f5   :  { %1492 = vmatprep.subr.mxu0 %v3025_v52  ;;  %1563 = vmatprep.subr.mxu1 %v3031_v60  ;;  %v3988_v54 = vld [vmem:[#allocation8_spill] sm:$0xff]  ;;  %v3989_v52 = vld [vmem:[#allocation5_spill] sm:$0xff] }
 0x6f6   :  { %1493 = vmatpush1.msra.mxu0 %v3037_v48  ;;  %1564 = vmatpush1.msra.mxu1 %v3043_v50  ;;  %v3990_v60 = vld [vmem:[#allocation17_spill] sm:$0xff]  ;;  %v3992_v50 = vld [vmem:[#allocation10_spill] sm:$0xff] }
 0x6f7   :  { %1494 = vmatprep.subr.mxu0 %v3049_v1  ;;  %1565 = vmatprep.subr.mxu1 %v3055_v4  ;;  %v3991_v48 = vld [vmem:[#allocation13_spill] sm:$0xff]  ;;  %v3993_v1 = vld [vmem:[#allocation6_spill] sm:$0xff] }
 0x6f8   :  { %1495 = vmatpush1.msra.mxu0 %v3061_v6  ;;  %1566 = vmatpush1.msra.mxu1 %v3067_v8  ;;  %v3994_v4 = vld [vmem:[#allocation18_spill] sm:$0xff]  ;;  %v3995_v6 = vld [vmem:[#allocation12_spill] sm:$0xff]  ;;  %v3996_v8 = vld [vmem:[#allocation19_spill] sm:$0xff] }
 0x6f9   :  { %1496 = vmatprep.subr.mxu0 %v3073_v11  ;;  %1567 = vmatprep.subr.mxu1 %v3079_v13  ;;  %v3997_v11 = vld [vmem:[#allocation14_spill] sm:$0xff]  ;;  %v3998_v13 = vmov 0.0  }
 0x6fa   :  { %1497 = vmatpush1.msra.mxu0 %v3085_v21  ;;  %1568 = vmatpush1.msra.mxu1 %v3091_v22  ;;  %v3999_v21 = vld [vmem:[#allocation20_spill] sm:$0xff]  ;;  %v1898_v22 = vld [vmem:[%s3777_s0 + $0xe0] sm:$0xff] }
 0x6fb   :  { %1498 = vmatprep.subr.mxu0 %v3097_v23  ;;  %1569 = vmatprep.subr.mxu1 %v3103_v24  ;;  %v1899_v24 = vld [vmem:[%s3777_s0 + $0xe8] sm:$0xff] }
 0x6fc   :  { %1499 = vmatpush1.msra.mxu0 %v3109_v25  ;;  %1570 = vmatpush1.msra.mxu1 %v3115_v26 }
 0x6fd   :  { %1500 = vmatprep.subr.mxu0 %v3121_v27  ;;  %1571 = vmatprep.subr.mxu1 %v3127_v28 }
 0x6fe   :  { %1501 = vmatpush1.msra.mxu0 %v3133_v29  ;;  %1572 = vmatpush1.msra.mxu1 %v3139_v30 }
 0x6ff   :  { %1502 = vmatprep.subr.mxu0 %v3145_v31  ;;  %1573 = vmatprep.subr.mxu1 %v3151_v32  ;;  %v1901_v31 = vld [vmem:[%s3777_s0 + $0xf8] sm:$0xff] }
 0x700   :  { %1503 = vmatpush1.msra.mxu0 %v3157_v33  ;;  %1574 = vmatpush1.msra.mxu1 %v3163_v34  ;;  %v1900_v34 = vld [vmem:[%s3777_s0 + $0xf0] sm:$0xff] }
 0x701   :  { %1504 = vmatprep.subr.mxu0 %v3169_v35  ;;  %1575 = vmatprep.subr.mxu1 %v3175_v36 }
 0x702   :  { %1505 = vmatpush1.msra.mxu0 %v3181_v37  ;;  %1576 = vmatpush1.msra.mxu1 %v3187_v38 }
 0x703   :  { %1506 = vmatprep.subr.mxu0 %v3193_v39  ;;  %1577 = vmatprep.subr.mxu1 %v3199_v40 }
 0x704   :  { %1507 = vmatpush1.msra.mxu0 %v3205_v41  ;;  %1578 = vmatpush1.msra.mxu1 %v3348_v18 }
 0x705   :  { %1508 = vmatprep.subr.mxu0 %v3212_v42  ;;  %1579 = vmatprep.subr.mxu1 %v3355_v63 }
 0x706   :  { %1509 = vmatpush1.msra.mxu0 %v3219_v43  ;;  %1580 = vmatpush1.msra.mxu1 %v3362_v57 }
 0x707   :  { %1510 = vmatprep.subr.mxu0 %v3226_v45  ;;  %1581 = vmatprep.subr.mxu1 %v3369_v62 }
 0x708   :  { %1511 = vmatpush1.msra.mxu0 %v3233_v47  ;;  %1582 = vmatpush1.msra.mxu1 %v3376_v12 }
 0x709   :  { %1512 = vmatprep.subr.mxu0 %v3983_v0  ;;  %1583 = vmatprep.subr.mxu1 %v3984_v53  ;;  %v1759_v0 = vld [vmem:[%s3779_s3 + $0x70] sm:$0xff]  ;;  %v1758_v53 = vld [vmem:[%s3779_s3 + $0x68] sm:$0xff] }
 0x70a   :  { %1513 = vmatpush1.msra.mxu0 %v3985_v56  ;;  %1584 = vmatpush1.msra.mxu1 %v3986_v3  ;;  %v1757_v56 = vld [vmem:[%s3779_s3 + $0x60] sm:$0xff]  ;;  %v1756_v3 = vld [vmem:[%s3779_s3 + $0x58] sm:$0xff] }
 0x70b   :  { %1514 = vmatprep.subr.mxu0 %v3987_v59  ;;  %1585 = vmatprep.subr.mxu1 %v3988_v54  ;;  %v1755_v59 = vld [vmem:[%s3779_s3 + $0x50] sm:$0xff]  ;;  %v1754_v54 = vld [vmem:[%s3779_s3 + $0x48] sm:$0xff] }
 0x70c   :  { %1515 = vmatpush1.msra.mxu0 %v3989_v52  ;;  %1586 = vmatpush1.msra.mxu1 %v3990_v60  ;;  %v1753_v52 = vld [vmem:[%s3779_s3 + $0x40] sm:$0xff]  ;;  %v1752_v60 = vld [vmem:[%s3779_s3 + $0x38] sm:$0xff] }
 0x70d   :  { %1516 = vmatprep.subr.mxu0 %v3991_v48  ;;  %1587 = vmatprep.subr.mxu1 %v3992_v50  ;;  %v1751_v48 = vld [vmem:[%s3779_s3 + $0x30] sm:$0xff]  ;;  %v1750_v50 = vld [vmem:[%s3779_s3 + $0x28] sm:$0xff] }
 0x70e   :  { %1517 = vmatpush1.msra.mxu0 %v3993_v1  ;;  %1588 = vmatpush1.msra.mxu1 %v3994_v4  ;;  %v1749_v1 = vld [vmem:[%s3779_s3 + $0x20] sm:$0xff]  ;;  %v1748_v4 = vld [vmem:[%s3779_s3 + $0x18] sm:$0xff] }
 0x70f   :  { %1518 = vmatprep.subr.mxu0 %v3995_v6  ;;  %1589 = vmatprep.subr.mxu1 %v3996_v8  ;;  %v1747_v6 = vld [vmem:[%s3779_s3 + $0x10] sm:$0xff]  ;;  %v1905_v8 = vld [vmem:[%s3777_s0 + $0x100] sm:$0xff] }
 0x710   :  { %1519 = vmatpush1.msra.mxu0 %v3997_v11  ;;  %1552 = vmatprep.mubr.f32.mxu0 %v3998_v13 }
 0x711   :  { %1590 = vmatpush1.msra.mxu1 %v3999_v21  ;;  %1623 = vmatprep.mubr.f32.mxu1 %v3998_v13  ;;  %v1906_v21 = vld [vmem:[%s3777_s0 + $0x108] sm:$0xff] }
 0x712   :  { %1948 = vmatprep.subr.mxu0 %v3998_v13  ;;  %1983 = vmatprep.subr.mxu1 %v3998_v13 }
 0x7b1   :  { %v1379_v23 = vpop.f32.mrf.mxu0  ;;  %v1450_v29 = vpop.f32.mrf.mxu1 }
 0x7b2   :  { %v1455_v25 = vadd.f32 %v1898_v22, %v1379_v23  ;;  %v1457_v37 = vadd.f32 %v1900_v34, %v1450_v29 }
 0x7b3   :  { %v1381_v26 = vpop.f32.mrf.mxu0  ;;  %v1452_v32 = vpop.f32.mrf.mxu1 }
 0x7b4   :  { %v1902_v27 = vmul.f32 -1.442695, %v1455_v25  ;;  %v1456_v28 = vadd.f32 %v1899_v24, %v1381_v26  ;;  %v1458_v33 = vadd.f32 %v1901_v31, %v1452_v32  ;;  %v1907_v31 = vld [vmem:[%s3777_s0 + $0x110] sm:$0xff] }
 0x7b6   :  { %2132 = vpow2.f32 %v1902_v27  ;;  %v1903_v30 = vmul.f32 -1.442695, %v1456_v28  ;;  %v1904_v35 = vmul.f32 -1.442695, %v1458_v33  ;;  %v1908_v28 = vld [vmem:[%s3777_s0 + $0x118] sm:$0xff] }
 0x7b8   :  { %2134 = vpow2.f32 %v1903_v30 }
 0x7b9   :  { %2136 = vpow2.f32 %v1904_v35 }
 0x7c3   :  { %v2133_v36 = vpop.eup %2132 }
 0x7c4   :  { %v1462_v38 = vadd.f32 1.0, %v2133_v36 }
 0x7c5   :  { %v2135_v39 = vpop.eup %2134 }
 0x7c6   :  { %2138 = vrcp.f32 %v1462_v38  ;;  %v1468_v40 = vadd.f32 1.0, %v2135_v39  ;;  %v2137_v41 = vpop.eup %2136 }
 0x7c7   :  { %2140 = vtanh.f32 %v1457_v37  ;;  %v1475_v47 = vadd.f32 1.0, %v2137_v41 }
 0x7c8   :  { %2142 = vrcp.f32 %v1468_v40 }
 0x7c9   :  { %2144 = vrcp.f32 %v1475_v47 }
 0x7d3   :  { %v2139_v42 = vpop.eup %2138 }
 0x7d4   :  { %v2141_v43 = vpop.eup %2140 }
 0x7d5   :  { %v2143_v45 = vpop.eup %2142  ;;  %v1479_v49 = vmul.f32 %v2141_v43, %v2139_v42 }
 0x7d6   :  { %v1478_v18 = vmul.f32 %v2143_v45, %v3544_v7  ;;  %v2145_v57 = vpop.eup %2144  ;;  %v1672_v7 = vld [vmem:[%s3778_s2 + $0x70] sm:$0xff] }
 0x7d8   :  { %v3626_v63 = vadd.f32 %v1479_v49, %v1478_v18 }
 0x7da   :  { %2146 = vtanh.f32 %v3626_v63 }
 0x7e7   :  { %v2147_v62 = vpop.eup %2146 }
 0x7e8   :  { %v1482_v12 = vmul.f32 %v2147_v62, %v2145_v57  ;;  %v1746_v62 = vld [vmem:[%s3779_s3 + $0x8] sm:$0xff] }
 0x7ea   :  { %1553 = vmatmul.mubr.f32.vlgmr.msra.gmra.mxu0 %v1482_v12  ;;  %1624 = vmatmul.mubr.f32.vlgmr.msra.gmra.mxu1 %v1482_v12  ;;  %v1745_v12 = vld [vmem:[%s3779_s3] sm:$0xff] }
 0x7eb   :  { %1949 = vmatpush3.msra.mxu0 %v1673_v14  ;;  %1980 = vmatprep.mubr.msk.f32.mxu0 %vm2233_vm0, %v3998_v13 }
 0x7ec   :  { %1950 = vmatprep.subr.mxu0 %v3998_v13  ;;  %2015 = vmatprep.mubr.msk.f32.mxu1 %vm2233_vm0, %v3998_v13 }
 0x7ed   :  { %1951 = vmatpush3.msra.mxu0 %v1672_v7  ;;  %1984 = vmatpush3.msra.mxu1 %v1760_v10 }
 0x7ee   :  { %1952 = vmatprep.subr.mxu0 %v3998_v13  ;;  %1985 = vmatprep.subr.mxu1 %v3998_v13 }
 0x7ef   :  { %1953 = vmatpush3.msra.mxu0 %v1671_v20  ;;  %1986 = vmatpush3.msra.mxu1 %v1759_v0 }
 0x7f0   :  { %1954 = vmatprep.subr.mxu0 %v3998_v13  ;;  %1987 = vmatprep.subr.mxu1 %v3998_v13 }
 0x7f1   :  { %1955 = vmatpush3.msra.mxu0 %v1670_v16  ;;  %1988 = vmatpush3.msra.mxu1 %v1758_v53  ;;  %v1912_v16 = vld [vmem:[%s3780_s4] ss:$0 sm:$0xff] }
 0x7f2   :  { %1956 = vmatprep.subr.mxu0 %v3998_v13  ;;  %1989 = vmatprep.subr.mxu1 %v3998_v13 }
 0x7f3   :  { %1957 = vmatpush3.msra.mxu0 %v1669_v46  ;;  %1990 = vmatpush3.msra.mxu1 %v1757_v56 }
 0x7f4   :  { %1958 = vmatprep.subr.mxu0 %v3998_v13  ;;  %1991 = vmatprep.subr.mxu1 %v3998_v13 }
 0x7f5   :  { %1959 = vmatpush3.msra.mxu0 %v1668_v55  ;;  %1992 = vmatpush3.msra.mxu1 %v1756_v3 }
 0x7f6   :  { %1960 = vmatprep.subr.mxu0 %v3998_v13  ;;  %1993 = vmatprep.subr.mxu1 %v3998_v13 }
 0x7f7   :  { %1961 = vmatpush3.msra.mxu0 %v1667_v51  ;;  %1994 = vmatpush3.msra.mxu1 %v1755_v59 }
 0x7f8   :  { %1962 = vmatprep.subr.mxu0 %v3998_v13  ;;  %1995 = vmatprep.subr.mxu1 %v3998_v13 }
 0x7f9   :  { %1963 = vmatpush3.msra.mxu0 %v1666_v17  ;;  %1996 = vmatpush3.msra.mxu1 %v1754_v54 }
 0x7fa   :  { %1964 = vmatprep.subr.mxu0 %v3998_v13  ;;  %1997 = vmatprep.subr.mxu1 %v3998_v13 }
 0x7fb   :  { %1965 = vmatpush3.msra.mxu0 %v1665_v19  ;;  %1998 = vmatpush3.msra.mxu1 %v1753_v52 }
 0x7fc   :  { %1966 = vmatprep.subr.mxu0 %v3998_v13  ;;  %1999 = vmatprep.subr.mxu1 %v3998_v13 }
 0x7fd   :  { %1967 = vmatpush3.msra.mxu0 %v1664_v58  ;;  %2000 = vmatpush3.msra.mxu1 %v1752_v60 }
 0x7fe   :  { %1968 = vmatprep.subr.mxu0 %v3998_v13  ;;  %2001 = vmatprep.subr.mxu1 %v3998_v13 }
 0x7ff   :  { %1969 = vmatpush3.msra.mxu0 %v1663_v9  ;;  %2002 = vmatpush3.msra.mxu1 %v1751_v48 }
 0x800   :  { %1970 = vmatprep.subr.mxu0 %v3998_v13  ;;  %2003 = vmatprep.subr.mxu1 %v3998_v13 }
 0x801   :  { %1971 = vmatpush3.msra.mxu0 %v1662_v44  ;;  %2004 = vmatpush3.msra.mxu1 %v1750_v50 }
 0x802   :  { %1972 = vmatprep.subr.mxu0 %v3998_v13  ;;  %2005 = vmatprep.subr.mxu1 %v3998_v13 }
 0x803   :  { %1973 = vmatpush3.msra.mxu0 %v1661_v5  ;;  %2006 = vmatpush3.msra.mxu1 %v1749_v1 }
 0x804   :  { %1974 = vmatprep.subr.mxu0 %v3998_v13  ;;  %2007 = vmatprep.subr.mxu1 %v3998_v13 }
 0x805   :  { %1975 = vmatpush3.msra.mxu0 %v1660_v2  ;;  %2008 = vmatpush3.msra.mxu1 %v1748_v4 }
 0x806   :  { %1976 = vmatprep.subr.mxu0 %v3998_v13  ;;  %2009 = vmatprep.subr.mxu1 %v3998_v13 }
 0x807   :  { %1977 = vmatpush3.msra.mxu0 %v1659_v15  ;;  %2010 = vmatpush3.msra.mxu1 %v1747_v6 }
 0x808   :  { %1978 = vmatprep.subr.mxu0 %v3998_v13  ;;  %2011 = vmatprep.subr.mxu1 %v3998_v13 }
 0x809   :  { %1979 = vmatpush3.msra.mxu0 %v1658_v61  ;;  %2012 = vmatpush3.msra.mxu1 %v1746_v62 }
 0x80a   :  { %2013 = vmatprep.subr.mxu1 %v3998_v13 }
 0x80b   :  { %2014 = vmatpush3.msra.mxu1 %v1745_v12 }
 0x8aa   :  { %v1554_v11 = vpop.f32.mrf.mxu0  ;;  %v1625_v26 = vpop.f32.mrf.mxu1 }
 0x8ab   :  { %v1630_v22 = vadd.f32 %v1905_v8, %v1554_v11  ;;  %v1632_v34 = vadd.f32 %v1907_v31, %v1625_v26 }
 0x8ac   :  { %v1556_v23 = vpop.f32.mrf.mxu0  ;;  %v1627_v29 = vpop.f32.mrf.mxu1 }
 0x8ad   :  { %v1909_v24 = vmul.f32 -1.442695, %v1630_v22  ;;  %v1631_v25 = vadd.f32 %v1906_v21, %v1556_v23  ;;  %v1633_v30 = vadd.f32 %v1908_v28, %v1627_v29 }
 0x8af   :  { %2148 = vpow2.f32 %v1909_v24  ;;  %v1910_v27 = vmul.f32 -1.442695, %v1631_v25  ;;  %v1911_v32 = vmul.f32 -1.442695, %v1633_v30 }
 0x8b1   :  { %2150 = vpow2.f32 %v1910_v27 }
 0x8b2   :  { %2152 = vpow2.f32 %v1911_v32 }
 0x8bc   :  { %v2149_v33 = vpop.eup %2148 }
 0x8bd   :  { %v1637_v35 = vadd.f32 1.0, %v2149_v33 }
 0x8be   :  { %v2151_v36 = vpop.eup %2150 }
 0x8bf   :  { %2154 = vrcp.f32 %v1637_v35  ;;  %v1643_v37 = vadd.f32 1.0, %v2151_v36  ;;  %v2153_v38 = vpop.eup %2152 }
 0x8c0   :  { %2156 = vtanh.f32 %v1632_v34  ;;  %v1650_v42 = vadd.f32 1.0, %v2153_v38 }
 0x8c1   :  { %2158 = vrcp.f32 %v1643_v37 }
 0x8c2   :  { %2160 = vrcp.f32 %v1650_v42 }
 0x8cc   :  { %v2155_v39 = vpop.eup %2154 }
 0x8cd   :  { %v2157_v40 = vpop.eup %2156 }
 0x8ce   :  { %v2159_v41 = vpop.eup %2158  ;;  %v1654_v43 = vmul.f32 %v2157_v40, %v2155_v39 }
 0x8cf   :  { %v1653_v45 = vmul.f32 %v2159_v41, %v3626_v63  ;;  %v2161_v49 = vpop.eup %2160 }
 0x8d1   :  { %v1655_v47 = vadd.f32 %v1654_v43, %v1653_v45 }
 0x8d3   :  { %2162 = vtanh.f32 %v1655_v47 }
 0x8e0   :  { %v2163_v18 = vpop.eup %2162 }
 0x8e1   :  { %v1657_v57 = vmul.f32 %v2163_v18, %v2161_v49 }
 0x8e3   :  { %1981 = vmatmul.mubr.f32.vlgmr.msra.gmra.mxu0 %v1657_v57 }
 0x9a3   :  { %v1740_v63 = vpop.f32.mrf.mxu0 }
 0x9a4   :  { %v1744_v14 = vmax.f32 %v1740_v63, 0.0 }
 0x9a5   :  { %v1982_v7 = vpop.f32.mrf.mxu0 }
 0x9a6   :  { %2016 = vmatmul.mubr.f32.vlgmr.msra.gmra.mxu1 %v1744_v14 }
 0xa66   :  { %v1827_v20 = vpop.f32.mrf.mxu1 }
 0xa67   :  { %v1831_v46 = vmax.f32 %v1827_v20, 0.0 }
 0xa68   :  { %v2017_v55 = vpop.f32.mrf.mxu1 }
 0xa69   :  { %v1839_v51 = vmul.f32 %v1912_v16, %v1831_v46 }
 0xa6b   :  { %1840 = vadd.xlane.f32.xlu0 %v1839_v51 }
 0xaf4   :  { %v1841_v17 = vpop.xlane.xlu0 %1840 }
 0xaf5   :  { %v1913_v13 = vmul.f32 -1.442695, %v1841_v17 }
 0xaf7   :  { %2164 = vpow2.f32 %v1913_v13 }
 0xb04   :  { %v2165_v19 = vpop.eup %2164 }
 0xb05   :  { %v1845_v58 = vadd.f32 1.0, %v2165_v19 }
 0xb07   :  { %2166 = vrcp.f32 %v1845_v58 }
 0xb14   :  { %v2167_v9 = vpop.eup %2166 }
 0xb15   :  { %1848 = vst [vmem:[%s3781_s5] sm:$0xff] %v2167_v9 }

</bundles_post_ra>
